<compile_context>
chip_gen: v7x
topology: tpu7x:2x2x1
jax: 0.10.0
libtpu: 0.0.40
codegen_flags: <defaults>
</compile_context>

<pallas_src>
import functools

import jax
import jax.numpy as jnp
from jax.experimental import pallas as pl
from jax.experimental.pallas import tpu as pltpu


# --------------------------------------------------------------------------
# Tsit5 (Tsitouras 2011) coefficients.
# --------------------------------------------------------------------------
_A21 = 0.161
_A31, _A32 = -0.008480655492356989, 0.335480655492357
_A41, _A42, _A43 = 2.8971530571054935, -6.359448489975075, 4.3622954328695815
_A51, _A52, _A53, _A54 = (5.325864828439257, -11.748883564062828,
                          7.4955393428898365, -0.09249506636175525)
_A61, _A62, _A63, _A64, _A65 = (5.86145544294642, -12.92096931784711,
                                8.159367898576159, -0.071584973281401,
                                -0.028269050394068383)
_B1, _B2, _B3, _B4, _B5, _B6 = (0.09646076681806523, 0.01, 0.4798896504144996,
                                1.379008574103742, -3.290069515436081,
                                2.324710524099774)


def _round_up(x, m):
    return ((x + m - 1) // m) * m


# --------------------------------------------------------------------------
# Fused Pallas kernel: one grid step integrates one interval [t_i, t_{i+1}]
# with `substeps` Tsit5 steps; all weights and the carried state stay in VMEM.
# --------------------------------------------------------------------------
def make_fused_tsit5_kernel(num_layers, hidden_dim, substeps):
    H = hidden_dim
    n_w = 2 * num_layers + 2          # (w, b) per LSTM layer + (fc_w, fc_b)

    def kernel(*refs):
        h_ref = refs[0]               # (num_intervals,) f32 in SMEM: substep h
        y0_ref = refs[1]              # (B_pad, D_pad) f32, VMEM resident
        w_refs = refs[2:2 + n_w]      # packed weights, VMEM resident
        out_ref = refs[2 + n_w]       # (B_pad, D_pad) output slab (interval i)
        y_scr = refs[3 + n_w]         # persistent VMEM state carry

        i = pl.program_id(0)

        @pl.when(i == 0)
        def _():
            y_scr[...] = y0_ref[...]

        # Weights are tiny and VMEM-resident; load once per grid step.
        layer_w = [(w_refs[2 * l][...], w_refs[2 * l + 1][...])
                   for l in range(num_layers)]
        fc_w = w_refs[2 * num_layers][...]
        fc_b = w_refs[2 * num_layers + 1][...]

        h = h_ref[i]                  # scalar substep size for this interval

        def vf(x):
            # Seq-len-1, zero-initial-state LSTM stack + final Linear:
            #   gates = x @ W_ih^T + (b_ih + b_hh)
            #   c = sigmoid(i) * tanh(g)      (forget gate * c0 == 0 dropped)
            #   hid = sigmoid(o) * tanh(c)
            a = x
            for (w, b) in layer_w:
                gates = jnp.dot(a, w, preferred_element_type=jnp.float32) + b
                i_g = jax.nn.sigmoid(gates[:, 0:H])
                g_g = jnp.tanh(gates[:, H:2 * H])
                o_g = jax.nn.sigmoid(gates[:, 2 * H:3 * H])
                a = o_g * jnp.tanh(i_g * g_g)
            return jnp.dot(a, fc_w, preferred_element_type=jnp.float32) + fc_b

        def tsit5_step(y):
            k1 = vf(y)
            k2 = vf(y + h * (_A21 * k1))
            k3 = vf(y + h * (_A31 * k1 + _A32 * k2))
            k4 = vf(y + h * (_A41 * k1 + _A42 * k2 + _A43 * k3))
            k5 = vf(y + h * (_A51 * k1 + _A52 * k2 + _A53 * k3 + _A54 * k4))
            k6 = vf(y + h * (_A61 * k1 + _A62 * k2 + _A63 * k3 + _A64 * k4
                             + _A65 * k5))
            return y + h * (_B1 * k1 + _B2 * k2 + _B3 * k3 + _B4 * k4
                            + _B5 * k5 + _B6 * k6)

        y_new = jax.lax.fori_loop(0, substeps, lambda _, y: tsit5_step(y),
                                  y_scr[...])
        y_scr[...] = y_new
        out_ref[...] = y_new

    return kernel


# --------------------------------------------------------------------------
# Wrapper: single pallas_call for the whole trajectory.
# --------------------------------------------------------------------------
def hybrid_ode_forward(y0, t, packed, *, num_layers, hidden_dim, output_dim,
                       substeps=4):
    """Returns sol with shape (len(t), batch, dim), like torchdyn NeuralODE."""
    B, D = y0.shape
    assert D == output_dim, "ODE state dim must equal vector-field output dim"
    num_intervals = t.shape[0] - 1
    B_pad = max(8, _round_up(B, 8))          # f32 sublane tile
    D_pad = _round_up(output_dim, 128)       # lane-dense state / output

    y0_pad = jnp.zeros((B_pad, D_pad), jnp.float32).at[:B, :D].set(
        y0.astype(jnp.float32))
    h_sub = ((t[1:] - t[:-1]) / substeps).astype(jnp.float32)

    flat = [h_sub, y0_pad]
    for (w, b) in packed["lstm"]:
        flat += [w, b]
    flat += [packed["fc_w"], packed["fc_b"]]

    kernel = make_fused_tsit5_kernel(num_layers, hidden_dim, substeps)

    in_specs = [pl.BlockSpec(memory_space=pltpu.MemorySpace.SMEM),   # h_sub
                pl.BlockSpec((B_pad, D_pad), lambda i: (0, 0))]      # y0
    in_specs += [pl.BlockSpec(a.shape, lambda i: (0, 0))             # weights
                 for a in flat[2:]]

    out_specs = pl.BlockSpec((None, B_pad, D_pad), lambda i: (i, 0, 0))
    out_shape = jax.ShapeDtypeStruct((num_intervals, B_pad, D_pad), jnp.float32)

    # Advisory cost estimate so XLA schedules around the (sequential) call.
    fevals = num_intervals * substeps * 6
    mm_flops = 2 * B_pad * (D_pad * 3 * hidden_dim
                            + (num_layers - 1) * hidden_dim * 3 * hidden_dim
                            + hidden_dim * D_pad)
    transc = fevals * num_layers * B_pad * 4 * hidden_dim
    bytes_accessed = (sum(int(a.size) * 4 for a in flat)
                      + num_intervals * B_pad * D_pad * 4)
    cost = pl.CostEstimate(flops=int(fevals * mm_flops),
                           transcendentals=int(transc),
                           bytes_accessed=int(bytes_accessed))

    sol_pad = pl.pallas_call(
        kernel,
        out_shape=out_shape,
        grid=(num_intervals,),
        in_specs=in_specs,
        out_specs=out_specs,
        scratch_shapes=[pltpu.VMEM((B_pad, D_pad), jnp.float32)],
        compiler_params=pltpu.CompilerParams(
            dimension_semantics=("arbitrary",)),   # sequential time dependence
        cost_estimate=cost,
    )(*flat)

    sol = jnp.concatenate([y0_pad[None], sol_pad], axis=0)
    return sol[:, :B, :output_dim]


# --------------------------------------------------------------------------
# PyTorch-equivalent raw parameters + packing into the kernel layout.
# --------------------------------------------------------------------------
def init_params(key, input_dim, hidden_dim, num_layers, output_dim):
    """Raw PyTorch-layout params, uniform(-k, k) with k = 1/sqrt(hidden)."""
    k = 1.0 / float(hidden_dim) ** 0.5
    params = {"lstm": []}
    for l in range(num_layers):
        in_dim = input_dim if l == 0 else hidden_dim
        key, k1, k2, k3 = jax.random.split(key, 4)
        w_ih = jax.random.uniform(k1, (4 * hidden_dim, in_dim),
                                  jnp.float32, -k, k)
        b_ih = jax.random.uniform(k2, (4 * hidden_dim,), jnp.float32, -k, k)
        b_hh = jax.random.uniform(k3, (4 * hidden_dim,), jnp.float32, -k, k)
        # NOTE: W_hh is irrelevant for a seq-len-1 call with h0 == 0.
        params["lstm"].append((w_ih, b_ih, b_hh))
    key, k4, k5 = jax.random.split(key, 3)
    params["fc_w"] = jax.random.uniform(k4, (output_dim, hidden_dim),
                                        jnp.float32, -k, k)
    params["fc_b"] = jax.random.uniform(k5, (output_dim,), jnp.float32, -k, k)
    return params


def pack_params(params, *, input_dim, hidden_dim, num_layers, output_dim):
    """Transpose, fold b_ih+b_hh, drop dead forget-gate cols, pad to lanes."""
    H = hidden_dim
    D_pad = _round_up(output_dim, 128)
    keep = jnp.concatenate([jnp.arange(0, H),            # i gate
                            jnp.arange(2 * H, 3 * H),    # g gate
                            jnp.arange(3 * H, 4 * H)])   # o gate
    packed = {"lstm": []}
    for l, (w_ih, b_ih, b_hh) in enumerate(params["lstm"]):
        w = w_ih[keep].T                                  # (in_l, 3H)
        b = (b_ih + b_hh)[keep][None, :]                  # (1, 3H)
        if l == 0:
            # Pad input rows so the padded state lanes contribute exactly 0.
            w = jnp.zeros((D_pad, 3 * H), jnp.float32).at[:input_dim].set(w)
        packed["lstm"].append((w, b))
    packed["fc_w"] = jnp.zeros((H, D_pad), jnp.float32).at[:, :output_dim].set(
        params["fc_w"].T)
    packed["fc_b"] = jnp.zeros((1, D_pad), jnp.float32).at[0, :output_dim].set(
        params["fc_b"])
    return packed


# --------------------------------------------------------------------------
# Pure-JAX reference (uses the raw PyTorch-layout params) for validation.
# --------------------------------------------------------------------------
def _tsit5_step(f, y, h):
    k1 = f(y)
    k2 = f(y + h * (_A21 * k1))
    k3 = f(y + h * (_A31 * k1 + _A32 * k2))
    k4 = f(y + h * (_A41 * k1 + _A42 * k2 + _A43 * k3))
    k5 = f(y + h * (_A51 * k1 + _A52 * k2 + _A53 * k3 + _A54 * k4))
    k6 = f(y + h * (_A61 * k1 + _A62 * k2 + _A63 * k3 + _A64 * k4 + _A65 * k5))
    return y + h * (_B1 * k1 + _B2 * k2 + _B3 * k3 + _B4 * k4
                    + _B5 * k5 + _B6 * k6)


def _reference_forward(y0, t, raw, *, num_layers, hidden_dim, substeps=4):
    H = hidden_dim

    def vf(y):
        x = y
        for (w_ih, b_ih, b_hh) in raw["lstm"]:
            gates = x @ w_ih.T + b_ih + b_hh
            i_g = jax.nn.sigmoid(gates[:, 0:H])
            # forget gate multiplies c0 == 0 -> dropped
            g_g = jnp.tanh(gates[:, 2 * H:3 * H])
            o_g = jax.nn.sigmoid(gates[:, 3 * H:4 * H])
            x = o_g * jnp.tanh(i_g * g_g)
        return x @ raw["fc_w"].T + raw["fc_b"]

    def interval(y, ts):
        t0, t1 = ts
        h = (t1 - t0) / substeps
        y = jax.lax.fori_loop(0, substeps,
                              lambda _, yy: _tsit5_step(vf, yy, h), y)
        return y, y

    _, ys = jax.lax.scan(interval, y0, (t[:-1], t[1:]))
    return jnp.concatenate([y0[None], ys], axis=0)


if __name__ == "__main__":
    # ODE state dimension must equal the vector-field output: input_dim == output_dim
    batch, input_dim, hidden_dim, num_layers, output_dim = 2, 4, 32, 2, 4

    key = jax.random.PRNGKey(0)
    key, ky = jax.random.split(key)
    raw = init_params(key, input_dim, hidden_dim, num_layers, output_dim)
    packed = pack_params(raw, input_dim=input_dim, hidden_dim=hidden_dim,
                         num_layers=num_layers, output_dim=output_dim)

    y0 = jax.random.normal(ky, (batch, input_dim), jnp.float32)
    t = jnp.linspace(0.0, 1.0, 5, dtype=jnp.float32)

    fwd = jax.jit(functools.partial(hybrid_ode_forward,
                                    num_layers=num_layers,
                                    hidden_dim=hidden_dim,
                                    output_dim=output_dim))
    sol = fwd(y0, t, packed)
    jax.block_until_ready(sol)
    assert sol.shape == (t.shape[0], batch, input_dim)

    ref = _reference_forward(y0, t, raw, num_layers=num_layers,
                             hidden_dim=hidden_dim)
    assert bool(jnp.allclose(sol, ref, atol=1e-3, rtol=1e-3)), "mismatch vs ref"

    print("KERNEL_OK")
</pallas_src>

<mosaic_0001>
module attributes {stable_mosaic.version = 11 : i64} {
  func.func @kernel(%arg0: i32, %arg1: memref<4xf32, #tpu.memory_space<smem>>, %arg2: memref<8x128xf32, #tpu.memory_space<vmem>>, %arg3: memref<128x96xf32, #tpu.memory_space<vmem>>, %arg4: memref<1x96xf32, #tpu.memory_space<vmem>>, %arg5: memref<32x96xf32, #tpu.memory_space<vmem>>, %arg6: memref<1x96xf32, #tpu.memory_space<vmem>>, %arg7: memref<32x128xf32, #tpu.memory_space<vmem>>, %arg8: memref<1x128xf32, #tpu.memory_space<vmem>>, %arg9: memref<1x8x128xf32, #tpu.memory_space<vmem>>, %arg10: memref<8x128xf32, #tpu.memory_space<vmem>>) attributes {dimension_semantics = [#tpu.dimension_semantics<arbitrary>], iteration_bounds = array<i64: 4>, scalar_prefetch = 0 : i64, scratch_operands = 1 : i64, tpu.core_type = #tpu.core_type<tc>, window_params = [{transform_indices = @transform_0, window_bounds = array<i64: 4>}, {pipeline_mode = #tpu.pipeline_mode<synchronous>, transform_indices = @transform_1, window_bounds = array<i64: 8, 128>}, {pipeline_mode = #tpu.pipeline_mode<synchronous>, transform_indices = @transform_2, window_bounds = array<i64: 128, 96>}, {pipeline_mode = #tpu.pipeline_mode<synchronous>, transform_indices = @transform_3, window_bounds = array<i64: 1, 96>}, {pipeline_mode = #tpu.pipeline_mode<synchronous>, transform_indices = @transform_4, window_bounds = array<i64: 32, 96>}, {pipeline_mode = #tpu.pipeline_mode<synchronous>, transform_indices = @transform_5, window_bounds = array<i64: 1, 96>}, {pipeline_mode = #tpu.pipeline_mode<synchronous>, transform_indices = @transform_6, window_bounds = array<i64: 32, 128>}, {pipeline_mode = #tpu.pipeline_mode<synchronous>, transform_indices = @transform_7, window_bounds = array<i64: 1, 128>}, {transform_indices = @transform_8, window_bounds = array<i64: 1, 8, 128>}]} {
    %c0_i32 = arith.constant 0 : i32
    %0 = arith.cmpi eq, %arg0, %c0_i32 : i32
    %1 = arith.extui %0 : i1 to i32
    %c0_i32_0 = arith.constant 0 : i32
    %2 = arith.cmpi ne, %1, %c0_i32_0 : i32
    scf.if %2 {
      %c0_20 = arith.constant 0 : index
      %c0_21 = arith.constant 0 : index
      %18 = vector.load %arg2[%c0_20, %c0_21] : memref<8x128xf32, #tpu.memory_space<vmem>>, vector<8x128xf32>
      %c0_22 = arith.constant 0 : index
      %c0_23 = arith.constant 0 : index
      %19 = vector.load %arg10[%c0_22, %c0_23] : memref<8x128xf32, #tpu.memory_space<vmem>>, vector<8x128xf32>
      tpu.vector_store %arg10[%c0_22, %c0_23], %18 {strides = array<i32>} : memref<8x128xf32, #tpu.memory_space<vmem>>, vector<8x128xf32>,
    } else {
    }
    %c0 = arith.constant 0 : index
    %c0_1 = arith.constant 0 : index
    %3 = vector.load %arg3[%c0, %c0_1] : memref<128x96xf32, #tpu.memory_space<vmem>>, vector<128x96xf32>
    %c0_2 = arith.constant 0 : index
    %c0_3 = arith.constant 0 : index
    %4 = vector.load %arg4[%c0_2, %c0_3] : memref<1x96xf32, #tpu.memory_space<vmem>>, vector<1x96xf32>
    %c0_4 = arith.constant 0 : index
    %c0_5 = arith.constant 0 : index
    %5 = vector.load %arg5[%c0_4, %c0_5] : memref<32x96xf32, #tpu.memory_space<vmem>>, vector<32x96xf32>
    %c0_6 = arith.constant 0 : index
    %c0_7 = arith.constant 0 : index
    %6 = vector.load %arg6[%c0_6, %c0_7] : memref<1x96xf32, #tpu.memory_space<vmem>>, vector<1x96xf32>
    %c0_8 = arith.constant 0 : index
    %c0_9 = arith.constant 0 : index
    %7 = vector.load %arg7[%c0_8, %c0_9] : memref<32x128xf32, #tpu.memory_space<vmem>>, vector<32x128xf32>
    %c0_10 = arith.constant 0 : index
    %c0_11 = arith.constant 0 : index
    %8 = vector.load %arg8[%c0_10, %c0_11] : memref<1x128xf32, #tpu.memory_space<vmem>>, vector<1x128xf32>
    %9 = arith.index_cast %arg0 : i32 to index
    %10 = memref.load %arg1[%9] : memref<4xf32, #tpu.memory_space<smem>>
    %c0_12 = arith.constant 0 : index
    %c0_13 = arith.constant 0 : index
    %11 = vector.load %arg10[%c0_12, %c0_13] : memref<8x128xf32, #tpu.memory_space<vmem>>, vector<8x128xf32>
    %c0_i32_14 = arith.constant 0 : i32
    %c4_i32 = arith.constant 4 : i32
    %12 = arith.addi %c0_i32_14, %c4_i32 : i32
    %c1_i32 = arith.constant 1 : i32
    %13 = scf.for %arg11 = %c0_i32_14 to %12 step %c1_i32 iter_args(%arg12 = %11) -> (vector<8x128xf32>)  : i32 {
      %cst = arith.constant dense<0.000000e+00> : vector<8x96xf32>
      %18 = tpu.matmul %arg12, %3, %cst {dimension_numbers = #tpu.dot_dimension_numbers<[1], [0], [0], [1], [0, 0, 1, 1], [], []>} : vector<8x128xf32>, vector<128x96xf32>, vector<8x96xf32> -> vector<8x96xf32>
      %19 = vector.broadcast %4 : vector<1x96xf32> to vector<8x96xf32>
      %20 = arith.addf %18, %19 : vector<8x96xf32>
      %21 = vector.extract_strided_slice %20 {offsets = [0, 0], sizes = [8, 32], strides = [1, 1]} : vector<8x96xf32> to vector<8x32xf32>
      %22 = arith.negf %21 : vector<8x32xf32>
      %23 = math.exp %22 : vector<8x32xf32>
      %cst_20 = arith.constant 1.000000e+00 : f32
      %24 = vector.broadcast %cst_20 : f32 to vector<8x32xf32>
      %25 = arith.addf %24, %23 : vector<8x32xf32>
      %26 = arith.divf %24, %25 : vector<8x32xf32>
      %27 = vector.extract_strided_slice %20 {offsets = [0, 32], sizes = [8, 32], strides = [1, 1]} : vector<8x96xf32> to vector<8x32xf32>
      %28 = math.tanh %27 : vector<8x32xf32>
      %29 = vector.extract_strided_slice %20 {offsets = [0, 64], sizes = [8, 32], strides = [1, 1]} : vector<8x96xf32> to vector<8x32xf32>
      %30 = arith.negf %29 : vector<8x32xf32>
      %31 = math.exp %30 : vector<8x32xf32>
      %cst_21 = arith.constant 1.000000e+00 : f32
      %32 = vector.broadcast %cst_21 : f32 to vector<8x32xf32>
      %33 = arith.addf %32, %31 : vector<8x32xf32>
      %34 = arith.divf %32, %33 : vector<8x32xf32>
      %35 = arith.mulf %26, %28 : vector<8x32xf32>
      %36 = math.tanh %35 : vector<8x32xf32>
      %37 = arith.mulf %34, %36 : vector<8x32xf32>
      %cst_22 = arith.constant dense<0.000000e+00> : vector<8x96xf32>
      %38 = tpu.matmul %37, %5, %cst_22 {dimension_numbers = #tpu.dot_dimension_numbers<[1], [0], [0], [1], [0, 0, 1, 1], [], []>} : vector<8x32xf32>, vector<32x96xf32>, vector<8x96xf32> -> vector<8x96xf32>
      %39 = vector.broadcast %6 : vector<1x96xf32> to vector<8x96xf32>
      %40 = arith.addf %38, %39 : vector<8x96xf32>
      %41 = vector.extract_strided_slice %40 {offsets = [0, 0], sizes = [8, 32], strides = [1, 1]} : vector<8x96xf32> to vector<8x32xf32>
      %42 = arith.negf %41 : vector<8x32xf32>
      %43 = math.exp %42 : vector<8x32xf32>
      %cst_23 = arith.constant 1.000000e+00 : f32
      %44 = vector.broadcast %cst_23 : f32 to vector<8x32xf32>
      %45 = arith.addf %44, %43 : vector<8x32xf32>
      %46 = arith.divf %44, %45 : vector<8x32xf32>
      %47 = vector.extract_strided_slice %40 {offsets = [0, 32], sizes = [8, 32], strides = [1, 1]} : vector<8x96xf32> to vector<8x32xf32>
      %48 = math.tanh %47 : vector<8x32xf32>
      %49 = vector.extract_strided_slice %40 {offsets = [0, 64], sizes = [8, 32], strides = [1, 1]} : vector<8x96xf32> to vector<8x32xf32>
      %50 = arith.negf %49 : vector<8x32xf32>
      %51 = math.exp %50 : vector<8x32xf32>
      %cst_24 = arith.constant 1.000000e+00 : f32
      %52 = vector.broadcast %cst_24 : f32 to vector<8x32xf32>
      %53 = arith.addf %52, %51 : vector<8x32xf32>
      %54 = arith.divf %52, %53 : vector<8x32xf32>
      %55 = arith.mulf %46, %48 : vector<8x32xf32>
      %56 = math.tanh %55 : vector<8x32xf32>
      %57 = arith.mulf %54, %56 : vector<8x32xf32>
      %cst_25 = arith.constant dense<0.000000e+00> : vector<8x128xf32>
      %58 = tpu.matmul %57, %7, %cst_25 {dimension_numbers = #tpu.dot_dimension_numbers<[1], [0], [0], [1], [0, 0, 1, 1], [], []>} : vector<8x32xf32>, vector<32x128xf32>, vector<8x128xf32> -> vector<8x128xf32>
      %59 = vector.broadcast %8 : vector<1x128xf32> to vector<8x128xf32>
      %60 = arith.addf %58, %59 : vector<8x128xf32>
      %cst_26 = arith.constant 1.610000e-01 : f32
      %61 = vector.broadcast %cst_26 : f32 to vector<8x128xf32>
      %62 = arith.mulf %61, %60 : vector<8x128xf32>
      %63 = vector.broadcast %10 : f32 to vector<8x128xf32>
      %64 = arith.mulf %63, %62 : vector<8x128xf32>
      %65 = arith.addf %arg12, %64 : vector<8x128xf32>
      %cst_27 = arith.constant dense<0.000000e+00> : vector<8x96xf32>
      %66 = tpu.matmul %65, %3, %cst_27 {dimension_numbers = #tpu.dot_dimension_numbers<[1], [0], [0], [1], [0, 0, 1, 1], [], []>} : vector<8x128xf32>, vector<128x96xf32>, vector<8x96xf32> -> vector<8x96xf32>
      %67 = vector.broadcast %4 : vector<1x96xf32> to vector<8x96xf32>
      %68 = arith.addf %66, %67 : vector<8x96xf32>
      %69 = vector.extract_strided_slice %68 {offsets = [0, 0], sizes = [8, 32], strides = [1, 1]} : vector<8x96xf32> to vector<8x32xf32>
      %70 = arith.negf %69 : vector<8x32xf32>
      %71 = math.exp %70 : vector<8x32xf32>
      %cst_28 = arith.constant 1.000000e+00 : f32
      %72 = vector.broadcast %cst_28 : f32 to vector<8x32xf32>
      %73 = arith.addf %72, %71 : vector<8x32xf32>
      %74 = arith.divf %72, %73 : vector<8x32xf32>
      %75 = vector.extract_strided_slice %68 {offsets = [0, 32], sizes = [8, 32], strides = [1, 1]} : vector<8x96xf32> to vector<8x32xf32>
      %76 = math.tanh %75 : vector<8x32xf32>
      %77 = vector.extract_strided_slice %68 {offsets = [0, 64], sizes = [8, 32], strides = [1, 1]} : vector<8x96xf32> to vector<8x32xf32>
      %78 = arith.negf %77 : vector<8x32xf32>
      %79 = math.exp %78 : vector<8x32xf32>
      %cst_29 = arith.constant 1.000000e+00 : f32
      %80 = vector.broadcast %cst_29 : f32 to vector<8x32xf32>
      %81 = arith.addf %80, %79 : vector<8x32xf32>
      %82 = arith.divf %80, %81 : vector<8x32xf32>
      %83 = arith.mulf %74, %76 : vector<8x32xf32>
      %84 = math.tanh %83 : vector<8x32xf32>
      %85 = arith.mulf %82, %84 : vector<8x32xf32>
      %cst_30 = arith.constant dense<0.000000e+00> : vector<8x96xf32>
      %86 = tpu.matmul %85, %5, %cst_30 {dimension_numbers = #tpu.dot_dimension_numbers<[1], [0], [0], [1], [0, 0, 1, 1], [], []>} : vector<8x32xf32>, vector<32x96xf32>, vector<8x96xf32> -> vector<8x96xf32>
      %87 = vector.broadcast %6 : vector<1x96xf32> to vector<8x96xf32>
      %88 = arith.addf %86, %87 : vector<8x96xf32>
      %89 = vector.extract_strided_slice %88 {offsets = [0, 0], sizes = [8, 32], strides = [1, 1]} : vector<8x96xf32> to vector<8x32xf32>
      %90 = arith.negf %89 : vector<8x32xf32>
      %91 = math.exp %90 : vector<8x32xf32>
      %cst_31 = arith.constant 1.000000e+00 : f32
      %92 = vector.broadcast %cst_31 : f32 to vector<8x32xf32>
      %93 = arith.addf %92, %91 : vector<8x32xf32>
      %94 = arith.divf %92, %93 : vector<8x32xf32>
      %95 = vector.extract_strided_slice %88 {offsets = [0, 32], sizes = [8, 32], strides = [1, 1]} : vector<8x96xf32> to vector<8x32xf32>
      %96 = math.tanh %95 : vector<8x32xf32>
      %97 = vector.extract_strided_slice %88 {offsets = [0, 64], sizes = [8, 32], strides = [1, 1]} : vector<8x96xf32> to vector<8x32xf32>
      %98 = arith.negf %97 : vector<8x32xf32>
      %99 = math.exp %98 : vector<8x32xf32>
      %cst_32 = arith.constant 1.000000e+00 : f32
      %100 = vector.broadcast %cst_32 : f32 to vector<8x32xf32>
      %101 = arith.addf %100, %99 : vector<8x32xf32>
      %102 = arith.divf %100, %101 : vector<8x32xf32>
      %103 = arith.mulf %94, %96 : vector<8x32xf32>
      %104 = math.tanh %103 : vector<8x32xf32>
      %105 = arith.mulf %102, %104 : vector<8x32xf32>
      %cst_33 = arith.constant dense<0.000000e+00> : vector<8x128xf32>
      %106 = tpu.matmul %105, %7, %cst_33 {dimension_numbers = #tpu.dot_dimension_numbers<[1], [0], [0], [1], [0, 0, 1, 1], [], []>} : vector<8x32xf32>, vector<32x128xf32>, vector<8x128xf32> -> vector<8x128xf32>
      %107 = vector.broadcast %8 : vector<1x128xf32> to vector<8x128xf32>
      %108 = arith.addf %106, %107 : vector<8x128xf32>
      %cst_34 = arith.constant -0.00848065502 : f32
      %109 = vector.broadcast %cst_34 : f32 to vector<8x128xf32>
      %110 = arith.mulf %109, %60 : vector<8x128xf32>
      %cst_35 = arith.constant 0.33548066 : f32
      %111 = vector.broadcast %cst_35 : f32 to vector<8x128xf32>
      %112 = arith.mulf %111, %108 : vector<8x128xf32>
      %113 = arith.addf %110, %112 : vector<8x128xf32>
      %114 = vector.broadcast %10 : f32 to vector<8x128xf32>
      %115 = arith.mulf %114, %113 : vector<8x128xf32>
      %116 = arith.addf %arg12, %115 : vector<8x128xf32>
      %cst_36 = arith.constant dense<0.000000e+00> : vector<8x96xf32>
      %117 = tpu.matmul %116, %3, %cst_36 {dimension_numbers = #tpu.dot_dimension_numbers<[1], [0], [0], [1], [0, 0, 1, 1], [], []>} : vector<8x128xf32>, vector<128x96xf32>, vector<8x96xf32> -> vector<8x96xf32>
      %118 = vector.broadcast %4 : vector<1x96xf32> to vector<8x96xf32>
      %119 = arith.addf %117, %118 : vector<8x96xf32>
      %120 = vector.extract_strided_slice %119 {offsets = [0, 0], sizes = [8, 32], strides = [1, 1]} : vector<8x96xf32> to vector<8x32xf32>
      %121 = arith.negf %120 : vector<8x32xf32>
      %122 = math.exp %121 : vector<8x32xf32>
      %cst_37 = arith.constant 1.000000e+00 : f32
      %123 = vector.broadcast %cst_37 : f32 to vector<8x32xf32>
      %124 = arith.addf %123, %122 : vector<8x32xf32>
      %125 = arith.divf %123, %124 : vector<8x32xf32>
      %126 = vector.extract_strided_slice %119 {offsets = [0, 32], sizes = [8, 32], strides = [1, 1]} : vector<8x96xf32> to vector<8x32xf32>
      %127 = math.tanh %126 : vector<8x32xf32>
      %128 = vector.extract_strided_slice %119 {offsets = [0, 64], sizes = [8, 32], strides = [1, 1]} : vector<8x96xf32> to vector<8x32xf32>
      %129 = arith.negf %128 : vector<8x32xf32>
      %130 = math.exp %129 : vector<8x32xf32>
      %cst_38 = arith.constant 1.000000e+00 : f32
      %131 = vector.broadcast %cst_38 : f32 to vector<8x32xf32>
      %132 = arith.addf %131, %130 : vector<8x32xf32>
      %133 = arith.divf %131, %132 : vector<8x32xf32>
      %134 = arith.mulf %125, %127 : vector<8x32xf32>
      %135 = math.tanh %134 : vector<8x32xf32>
      %136 = arith.mulf %133, %135 : vector<8x32xf32>
      %cst_39 = arith.constant dense<0.000000e+00> : vector<8x96xf32>
      %137 = tpu.matmul %136, %5, %cst_39 {dimension_numbers = #tpu.dot_dimension_numbers<[1], [0], [0], [1], [0, 0, 1, 1], [], []>} : vector<8x32xf32>, vector<32x96xf32>, vector<8x96xf32> -> vector<8x96xf32>
      %138 = vector.broadcast %6 : vector<1x96xf32> to vector<8x96xf32>
      %139 = arith.addf %137, %138 : vector<8x96xf32>
      %140 = vector.extract_strided_slice %139 {offsets = [0, 0], sizes = [8, 32], strides = [1, 1]} : vector<8x96xf32> to vector<8x32xf32>
      %141 = arith.negf %140 : vector<8x32xf32>
      %142 = math.exp %141 : vector<8x32xf32>
      %cst_40 = arith.constant 1.000000e+00 : f32
      %143 = vector.broadcast %cst_40 : f32 to vector<8x32xf32>
      %144 = arith.addf %143, %142 : vector<8x32xf32>
      %145 = arith.divf %143, %144 : vector<8x32xf32>
      %146 = vector.extract_strided_slice %139 {offsets = [0, 32], sizes = [8, 32], strides = [1, 1]} : vector<8x96xf32> to vector<8x32xf32>
      %147 = math.tanh %146 : vector<8x32xf32>
      %148 = vector.extract_strided_slice %139 {offsets = [0, 64], sizes = [8, 32], strides = [1, 1]} : vector<8x96xf32> to vector<8x32xf32>
      %149 = arith.negf %148 : vector<8x32xf32>
      %150 = math.exp %149 : vector<8x32xf32>
      %cst_41 = arith.constant 1.000000e+00 : f32
      %151 = vector.broadcast %cst_41 : f32 to vector<8x32xf32>
      %152 = arith.addf %151, %150 : vector<8x32xf32>
      %153 = arith.divf %151, %152 : vector<8x32xf32>
      %154 = arith.mulf %145, %147 : vector<8x32xf32>
      %155 = math.tanh %154 : vector<8x32xf32>
      %156 = arith.mulf %153, %155 : vector<8x32xf32>
      %cst_42 = arith.constant dense<0.000000e+00> : vector<8x128xf32>
      %157 = tpu.matmul %156, %7, %cst_42 {dimension_numbers = #tpu.dot_dimension_numbers<[1], [0], [0], [1], [0, 0, 1, 1], [], []>} : vector<8x32xf32>, vector<32x128xf32>, vector<8x128xf32> -> vector<8x128xf32>
      %158 = vector.broadcast %8 : vector<1x128xf32> to vector<8x128xf32>
      %159 = arith.addf %157, %158 : vector<8x128xf32>
      %cst_43 = arith.constant 2.89715314 : f32
      %160 = vector.broadcast %cst_43 : f32 to vector<8x128xf32>
      %161 = arith.mulf %160, %60 : vector<8x128xf32>
      %cst_44 = arith.constant -6.35944843 : f32
      %162 = vector.broadcast %cst_44 : f32 to vector<8x128xf32>
      %163 = arith.mulf %162, %108 : vector<8x128xf32>
      %164 = arith.addf %161, %163 : vector<8x128xf32>
      %cst_45 = arith.constant 4.36229563 : f32
      %165 = vector.broadcast %cst_45 : f32 to vector<8x128xf32>
      %166 = arith.mulf %165, %159 : vector<8x128xf32>
      %167 = arith.addf %164, %166 : vector<8x128xf32>
      %168 = vector.broadcast %10 : f32 to vector<8x128xf32>
      %169 = arith.mulf %168, %167 : vector<8x128xf32>
      %170 = arith.addf %arg12, %169 : vector<8x128xf32>
      %cst_46 = arith.constant dense<0.000000e+00> : vector<8x96xf32>
      %171 = tpu.matmul %170, %3, %cst_46 {dimension_numbers = #tpu.dot_dimension_numbers<[1], [0], [0], [1], [0, 0, 1, 1], [], []>} : vector<8x128xf32>, vector<128x96xf32>, vector<8x96xf32> -> vector<8x96xf32>
      %172 = vector.broadcast %4 : vector<1x96xf32> to vector<8x96xf32>
      %173 = arith.addf %171, %172 : vector<8x96xf32>
      %174 = vector.extract_strided_slice %173 {offsets = [0, 0], sizes = [8, 32], strides = [1, 1]} : vector<8x96xf32> to vector<8x32xf32>
      %175 = arith.negf %174 : vector<8x32xf32>
      %176 = math.exp %175 : vector<8x32xf32>
      %cst_47 = arith.constant 1.000000e+00 : f32
      %177 = vector.broadcast %cst_47 : f32 to vector<8x32xf32>
      %178 = arith.addf %177, %176 : vector<8x32xf32>
      %179 = arith.divf %177, %178 : vector<8x32xf32>
      %180 = vector.extract_strided_slice %173 {offsets = [0, 32], sizes = [8, 32], strides = [1, 1]} : vector<8x96xf32> to vector<8x32xf32>
      %181 = math.tanh %180 : vector<8x32xf32>
      %182 = vector.extract_strided_slice %173 {offsets = [0, 64], sizes = [8, 32], strides = [1, 1]} : vector<8x96xf32> to vector<8x32xf32>
      %183 = arith.negf %182 : vector<8x32xf32>
      %184 = math.exp %183 : vector<8x32xf32>
      %cst_48 = arith.constant 1.000000e+00 : f32
      %185 = vector.broadcast %cst_48 : f32 to vector<8x32xf32>
      %186 = arith.addf %185, %184 : vector<8x32xf32>
      %187 = arith.divf %185, %186 : vector<8x32xf32>
      %188 = arith.mulf %179, %181 : vector<8x32xf32>
      %189 = math.tanh %188 : vector<8x32xf32>
      %190 = arith.mulf %187, %189 : vector<8x32xf32>
      %cst_49 = arith.constant dense<0.000000e+00> : vector<8x96xf32>
      %191 = tpu.matmul %190, %5, %cst_49 {dimension_numbers = #tpu.dot_dimension_numbers<[1], [0], [0], [1], [0, 0, 1, 1], [], []>} : vector<8x32xf32>, vector<32x96xf32>, vector<8x96xf32> -> vector<8x96xf32>
      %192 = vector.broadcast %6 : vector<1x96xf32> to vector<8x96xf32>
      %193 = arith.addf %191, %192 : vector<8x96xf32>
      %194 = vector.extract_strided_slice %193 {offsets = [0, 0], sizes = [8, 32], strides = [1, 1]} : vector<8x96xf32> to vector<8x32xf32>
      %195 = arith.negf %194 : vector<8x32xf32>
      %196 = math.exp %195 : vector<8x32xf32>
      %cst_50 = arith.constant 1.000000e+00 : f32
      %197 = vector.broadcast %cst_50 : f32 to vector<8x32xf32>
      %198 = arith.addf %197, %196 : vector<8x32xf32>
      %199 = arith.divf %197, %198 : vector<8x32xf32>
      %200 = vector.extract_strided_slice %193 {offsets = [0, 32], sizes = [8, 32], strides = [1, 1]} : vector<8x96xf32> to vector<8x32xf32>
      %201 = math.tanh %200 : vector<8x32xf32>
      %202 = vector.extract_strided_slice %193 {offsets = [0, 64], sizes = [8, 32], strides = [1, 1]} : vector<8x96xf32> to vector<8x32xf32>
      %203 = arith.negf %202 : vector<8x32xf32>
      %204 = math.exp %203 : vector<8x32xf32>
      %cst_51 = arith.constant 1.000000e+00 : f32
      %205 = vector.broadcast %cst_51 : f32 to vector<8x32xf32>
      %206 = arith.addf %205, %204 : vector<8x32xf32>
      %207 = arith.divf %205, %206 : vector<8x32xf32>
      %208 = arith.mulf %199, %201 : vector<8x32xf32>
      %209 = math.tanh %208 : vector<8x32xf32>
      %210 = arith.mulf %207, %209 : vector<8x32xf32>
      %cst_52 = arith.constant dense<0.000000e+00> : vector<8x128xf32>
      %211 = tpu.matmul %210, %7, %cst_52 {dimension_numbers = #tpu.dot_dimension_numbers<[1], [0], [0], [1], [0, 0, 1, 1], [], []>} : vector<8x32xf32>, vector<32x128xf32>, vector<8x128xf32> -> vector<8x128xf32>
      %212 = vector.broadcast %8 : vector<1x128xf32> to vector<8x128xf32>
      %213 = arith.addf %211, %212 : vector<8x128xf32>
      %cst_53 = arith.constant 5.32586479 : f32
      %214 = vector.broadcast %cst_53 : f32 to vector<8x128xf32>
      %215 = arith.mulf %214, %60 : vector<8x128xf32>
      %cst_54 = arith.constant -11.7488832 : f32
      %216 = vector.broadcast %cst_54 : f32 to vector<8x128xf32>
      %217 = arith.mulf %216, %108 : vector<8x128xf32>
      %218 = arith.addf %215, %217 : vector<8x128xf32>
      %cst_55 = arith.constant 7.49553919 : f32
      %219 = vector.broadcast %cst_55 : f32 to vector<8x128xf32>
      %220 = arith.mulf %219, %159 : vector<8x128xf32>
      %221 = arith.addf %218, %220 : vector<8x128xf32>
      %cst_56 = arith.constant -0.0924950689 : f32
      %222 = vector.broadcast %cst_56 : f32 to vector<8x128xf32>
      %223 = arith.mulf %222, %213 : vector<8x128xf32>
      %224 = arith.addf %221, %223 : vector<8x128xf32>
      %225 = vector.broadcast %10 : f32 to vector<8x128xf32>
      %226 = arith.mulf %225, %224 : vector<8x128xf32>
      %227 = arith.addf %arg12, %226 : vector<8x128xf32>
      %cst_57 = arith.constant dense<0.000000e+00> : vector<8x96xf32>
      %228 = tpu.matmul %227, %3, %cst_57 {dimension_numbers = #tpu.dot_dimension_numbers<[1], [0], [0], [1], [0, 0, 1, 1], [], []>} : vector<8x128xf32>, vector<128x96xf32>, vector<8x96xf32> -> vector<8x96xf32>
      %229 = vector.broadcast %4 : vector<1x96xf32> to vector<8x96xf32>
      %230 = arith.addf %228, %229 : vector<8x96xf32>
      %231 = vector.extract_strided_slice %230 {offsets = [0, 0], sizes = [8, 32], strides = [1, 1]} : vector<8x96xf32> to vector<8x32xf32>
      %232 = arith.negf %231 : vector<8x32xf32>
      %233 = math.exp %232 : vector<8x32xf32>
      %cst_58 = arith.constant 1.000000e+00 : f32
      %234 = vector.broadcast %cst_58 : f32 to vector<8x32xf32>
      %235 = arith.addf %234, %233 : vector<8x32xf32>
      %236 = arith.divf %234, %235 : vector<8x32xf32>
      %237 = vector.extract_strided_slice %230 {offsets = [0, 32], sizes = [8, 32], strides = [1, 1]} : vector<8x96xf32> to vector<8x32xf32>
      %238 = math.tanh %237 : vector<8x32xf32>
      %239 = vector.extract_strided_slice %230 {offsets = [0, 64], sizes = [8, 32], strides = [1, 1]} : vector<8x96xf32> to vector<8x32xf32>
      %240 = arith.negf %239 : vector<8x32xf32>
      %241 = math.exp %240 : vector<8x32xf32>
      %cst_59 = arith.constant 1.000000e+00 : f32
      %242 = vector.broadcast %cst_59 : f32 to vector<8x32xf32>
      %243 = arith.addf %242, %241 : vector<8x32xf32>
      %244 = arith.divf %242, %243 : vector<8x32xf32>
      %245 = arith.mulf %236, %238 : vector<8x32xf32>
      %246 = math.tanh %245 : vector<8x32xf32>
      %247 = arith.mulf %244, %246 : vector<8x32xf32>
      %cst_60 = arith.constant dense<0.000000e+00> : vector<8x96xf32>
      %248 = tpu.matmul %247, %5, %cst_60 {dimension_numbers = #tpu.dot_dimension_numbers<[1], [0], [0], [1], [0, 0, 1, 1], [], []>} : vector<8x32xf32>, vector<32x96xf32>, vector<8x96xf32> -> vector<8x96xf32>
      %249 = vector.broadcast %6 : vector<1x96xf32> to vector<8x96xf32>
      %250 = arith.addf %248, %249 : vector<8x96xf32>
      %251 = vector.extract_strided_slice %250 {offsets = [0, 0], sizes = [8, 32], strides = [1, 1]} : vector<8x96xf32> to vector<8x32xf32>
      %252 = arith.negf %251 : vector<8x32xf32>
      %253 = math.exp %252 : vector<8x32xf32>
      %cst_61 = arith.constant 1.000000e+00 : f32
      %254 = vector.broadcast %cst_61 : f32 to vector<8x32xf32>
      %255 = arith.addf %254, %253 : vector<8x32xf32>
      %256 = arith.divf %254, %255 : vector<8x32xf32>
      %257 = vector.extract_strided_slice %250 {offsets = [0, 32], sizes = [8, 32], strides = [1, 1]} : vector<8x96xf32> to vector<8x32xf32>
      %258 = math.tanh %257 : vector<8x32xf32>
      %259 = vector.extract_strided_slice %250 {offsets = [0, 64], sizes = [8, 32], strides = [1, 1]} : vector<8x96xf32> to vector<8x32xf32>
      %260 = arith.negf %259 : vector<8x32xf32>
      %261 = math.exp %260 : vector<8x32xf32>
      %cst_62 = arith.constant 1.000000e+00 : f32
      %262 = vector.broadcast %cst_62 : f32 to vector<8x32xf32>
      %263 = arith.addf %262, %261 : vector<8x32xf32>
      %264 = arith.divf %262, %263 : vector<8x32xf32>
      %265 = arith.mulf %256, %258 : vector<8x32xf32>
      %266 = math.tanh %265 : vector<8x32xf32>
      %267 = arith.mulf %264, %266 : vector<8x32xf32>
      %cst_63 = arith.constant dense<0.000000e+00> : vector<8x128xf32>
      %268 = tpu.matmul %267, %7, %cst_63 {dimension_numbers = #tpu.dot_dimension_numbers<[1], [0], [0], [1], [0, 0, 1, 1], [], []>} : vector<8x32xf32>, vector<32x128xf32>, vector<8x128xf32> -> vector<8x128xf32>
      %269 = vector.broadcast %8 : vector<1x128xf32> to vector<8x128xf32>
      %270 = arith.addf %268, %269 : vector<8x128xf32>
      %cst_64 = arith.constant 5.86145544 : f32
      %271 = vector.broadcast %cst_64 : f32 to vector<8x128xf32>
      %272 = arith.mulf %271, %60 : vector<8x128xf32>
      %cst_65 = arith.constant -12.920969 : f32
      %273 = vector.broadcast %cst_65 : f32 to vector<8x128xf32>
      %274 = arith.mulf %273, %108 : vector<8x128xf32>
      %275 = arith.addf %272, %274 : vector<8x128xf32>
      %cst_66 = arith.constant 8.15936756 : f32
      %276 = vector.broadcast %cst_66 : f32 to vector<8x128xf32>
      %277 = arith.mulf %276, %159 : vector<8x128xf32>
      %278 = arith.addf %275, %277 : vector<8x128xf32>
      %cst_67 = arith.constant -0.0715849697 : f32
      %279 = vector.broadcast %cst_67 : f32 to vector<8x128xf32>
      %280 = arith.mulf %279, %213 : vector<8x128xf32>
      %281 = arith.addf %278, %280 : vector<8x128xf32>
      %cst_68 = arith.constant -0.0282690506 : f32
      %282 = vector.broadcast %cst_68 : f32 to vector<8x128xf32>
      %283 = arith.mulf %282, %270 : vector<8x128xf32>
      %284 = arith.addf %281, %283 : vector<8x128xf32>
      %285 = vector.broadcast %10 : f32 to vector<8x128xf32>
      %286 = arith.mulf %285, %284 : vector<8x128xf32>
      %287 = arith.addf %arg12, %286 : vector<8x128xf32>
      %cst_69 = arith.constant dense<0.000000e+00> : vector<8x96xf32>
      %288 = tpu.matmul %287, %3, %cst_69 {dimension_numbers = #tpu.dot_dimension_numbers<[1], [0], [0], [1], [0, 0, 1, 1], [], []>} : vector<8x128xf32>, vector<128x96xf32>, vector<8x96xf32> -> vector<8x96xf32>
      %289 = vector.broadcast %4 : vector<1x96xf32> to vector<8x96xf32>
      %290 = arith.addf %288, %289 : vector<8x96xf32>
      %291 = vector.extract_strided_slice %290 {offsets = [0, 0], sizes = [8, 32], strides = [1, 1]} : vector<8x96xf32> to vector<8x32xf32>
      %292 = arith.negf %291 : vector<8x32xf32>
      %293 = math.exp %292 : vector<8x32xf32>
      %cst_70 = arith.constant 1.000000e+00 : f32
      %294 = vector.broadcast %cst_70 : f32 to vector<8x32xf32>
      %295 = arith.addf %294, %293 : vector<8x32xf32>
      %296 = arith.divf %294, %295 : vector<8x32xf32>
      %297 = vector.extract_strided_slice %290 {offsets = [0, 32], sizes = [8, 32], strides = [1, 1]} : vector<8x96xf32> to vector<8x32xf32>
      %298 = math.tanh %297 : vector<8x32xf32>
      %299 = vector.extract_strided_slice %290 {offsets = [0, 64], sizes = [8, 32], strides = [1, 1]} : vector<8x96xf32> to vector<8x32xf32>
      %300 = arith.negf %299 : vector<8x32xf32>
      %301 = math.exp %300 : vector<8x32xf32>
      %cst_71 = arith.constant 1.000000e+00 : f32
      %302 = vector.broadcast %cst_71 : f32 to vector<8x32xf32>
      %303 = arith.addf %302, %301 : vector<8x32xf32>
      %304 = arith.divf %302, %303 : vector<8x32xf32>
      %305 = arith.mulf %296, %298 : vector<8x32xf32>
      %306 = math.tanh %305 : vector<8x32xf32>
      %307 = arith.mulf %304, %306 : vector<8x32xf32>
      %cst_72 = arith.constant dense<0.000000e+00> : vector<8x96xf32>
      %308 = tpu.matmul %307, %5, %cst_72 {dimension_numbers = #tpu.dot_dimension_numbers<[1], [0], [0], [1], [0, 0, 1, 1], [], []>} : vector<8x32xf32>, vector<32x96xf32>, vector<8x96xf32> -> vector<8x96xf32>
      %309 = vector.broadcast %6 : vector<1x96xf32> to vector<8x96xf32>
      %310 = arith.addf %308, %309 : vector<8x96xf32>
      %311 = vector.extract_strided_slice %310 {offsets = [0, 0], sizes = [8, 32], strides = [1, 1]} : vector<8x96xf32> to vector<8x32xf32>
      %312 = arith.negf %311 : vector<8x32xf32>
      %313 = math.exp %312 : vector<8x32xf32>
      %cst_73 = arith.constant 1.000000e+00 : f32
      %314 = vector.broadcast %cst_73 : f32 to vector<8x32xf32>
      %315 = arith.addf %314, %313 : vector<8x32xf32>
      %316 = arith.divf %314, %315 : vector<8x32xf32>
      %317 = vector.extract_strided_slice %310 {offsets = [0, 32], sizes = [8, 32], strides = [1, 1]} : vector<8x96xf32> to vector<8x32xf32>
      %318 = math.tanh %317 : vector<8x32xf32>
      %319 = vector.extract_strided_slice %310 {offsets = [0, 64], sizes = [8, 32], strides = [1, 1]} : vector<8x96xf32> to vector<8x32xf32>
      %320 = arith.negf %319 : vector<8x32xf32>
      %321 = math.exp %320 : vector<8x32xf32>
      %cst_74 = arith.constant 1.000000e+00 : f32
      %322 = vector.broadcast %cst_74 : f32 to vector<8x32xf32>
      %323 = arith.addf %322, %321 : vector<8x32xf32>
      %324 = arith.divf %322, %323 : vector<8x32xf32>
      %325 = arith.mulf %316, %318 : vector<8x32xf32>
      %326 = math.tanh %325 : vector<8x32xf32>
      %327 = arith.mulf %324, %326 : vector<8x32xf32>
      %cst_75 = arith.constant dense<0.000000e+00> : vector<8x128xf32>
      %328 = tpu.matmul %327, %7, %cst_75 {dimension_numbers = #tpu.dot_dimension_numbers<[1], [0], [0], [1], [0, 0, 1, 1], [], []>} : vector<8x32xf32>, vector<32x128xf32>, vector<8x128xf32> -> vector<8x128xf32>
      %329 = vector.broadcast %8 : vector<1x128xf32> to vector<8x128xf32>
      %330 = arith.addf %328, %329 : vector<8x128xf32>
      %cst_76 = arith.constant 0.096460767 : f32
      %331 = vector.broadcast %cst_76 : f32 to vector<8x128xf32>
      %332 = arith.mulf %331, %60 : vector<8x128xf32>
      %cst_77 = arith.constant 0.00999999977 : f32
      %333 = vector.broadcast %cst_77 : f32 to vector<8x128xf32>
      %334 = arith.mulf %333, %108 : vector<8x128xf32>
      %335 = arith.addf %332, %334 : vector<8x128xf32>
      %cst_78 = arith.constant 0.479889661 : f32
      %336 = vector.broadcast %cst_78 : f32 to vector<8x128xf32>
      %337 = arith.mulf %336, %159 : vector<8x128xf32>
      %338 = arith.addf %335, %337 : vector<8x128xf32>
      %cst_79 = arith.constant 1.37900853 : f32
      %339 = vector.broadcast %cst_79 : f32 to vector<8x128xf32>
      %340 = arith.mulf %339, %213 : vector<8x128xf32>
      %341 = arith.addf %338, %340 : vector<8x128xf32>
      %cst_80 = arith.constant -3.29006958 : f32
      %342 = vector.broadcast %cst_80 : f32 to vector<8x128xf32>
      %343 = arith.mulf %342, %270 : vector<8x128xf32>
      %344 = arith.addf %341, %343 : vector<8x128xf32>
      %cst_81 = arith.constant 2.32471061 : f32
      %345 = vector.broadcast %cst_81 : f32 to vector<8x128xf32>
      %346 = arith.mulf %345, %330 : vector<8x128xf32>
      %347 = arith.addf %344, %346 : vector<8x128xf32>
      %348 = vector.broadcast %10 : f32 to vector<8x128xf32>
      %349 = arith.mulf %348, %347 : vector<8x128xf32>
      %350 = arith.addf %arg12, %349 : vector<8x128xf32>
      scf.yield %350 : vector<8x128xf32>
    }
    %c0_15 = arith.constant 0 : index
    %c0_16 = arith.constant 0 : index
    %14 = vector.load %arg10[%c0_15, %c0_16] : memref<8x128xf32, #tpu.memory_space<vmem>>, vector<8x128xf32>
    tpu.vector_store %arg10[%c0_15, %c0_16], %13 {strides = array<i32>} : memref<8x128xf32, #tpu.memory_space<vmem>>, vector<8x128xf32>,
    %c0_17 = arith.constant 0 : index
    %c0_18 = arith.constant 0 : index
    %c0_19 = arith.constant 0 : index
    %15 = vector.load %arg9[%c0_17, %c0_18, %c0_19] : memref<1x8x128xf32, #tpu.memory_space<vmem>>, vector<1x8x128xf32>
    %16 = vector.shape_cast %15 : vector<1x8x128xf32> to vector<8x128xf32>
    %17 = vector.shape_cast %13 : vector<8x128xf32> to vector<1x8x128xf32>
    tpu.vector_store %arg9[%c0_17, %c0_18, %c0_19], %17 {strides = array<i32>} : memref<1x8x128xf32, #tpu.memory_space<vmem>>, vector<1x8x128xf32>,
    return
  }
  func.func @transform_0(%arg0: i32) -> i32 {
    %c0_i32 = arith.constant 0 : i32
    %c0_i32_0 = arith.constant 0 : i32
    return %c0_i32 : i32
  }
  func.func @transform_1(%arg0: i32) -> (i32, i32) {
    %c0_i32 = arith.constant 0 : i32
    %c0_i32_0 = arith.constant 0 : i32
    %c0_i32_1 = arith.constant 0 : i32
    return %c0_i32, %c0_i32_0 : i32, i32
  }
  func.func @transform_2(%arg0: i32) -> (i32, i32) {
    %c0_i32 = arith.constant 0 : i32
    %c0_i32_0 = arith.constant 0 : i32
    %c0_i32_1 = arith.constant 0 : i32
    return %c0_i32, %c0_i32_0 : i32, i32
  }
  func.func @transform_3(%arg0: i32) -> (i32, i32) {
    %c0_i32 = arith.constant 0 : i32
    %c0_i32_0 = arith.constant 0 : i32
    %c0_i32_1 = arith.constant 0 : i32
    return %c0_i32, %c0_i32_0 : i32, i32
  }
  func.func @transform_4(%arg0: i32) -> (i32, i32) {
    %c0_i32 = arith.constant 0 : i32
    %c0_i32_0 = arith.constant 0 : i32
    %c0_i32_1 = arith.constant 0 : i32
    return %c0_i32, %c0_i32_0 : i32, i32
  }
  func.func @transform_5(%arg0: i32) -> (i32, i32) {
    %c0_i32 = arith.constant 0 : i32
    %c0_i32_0 = arith.constant 0 : i32
    %c0_i32_1 = arith.constant 0 : i32
    return %c0_i32, %c0_i32_0 : i32, i32
  }
  func.func @transform_6(%arg0: i32) -> (i32, i32) {
    %c0_i32 = arith.constant 0 : i32
    %c0_i32_0 = arith.constant 0 : i32
    %c0_i32_1 = arith.constant 0 : i32
    return %c0_i32, %c0_i32_0 : i32, i32
  }
  func.func @transform_7(%arg0: i32) -> (i32, i32) {
    %c0_i32 = arith.constant 0 : i32
    %c0_i32_0 = arith.constant 0 : i32
    %c0_i32_1 = arith.constant 0 : i32
    return %c0_i32, %c0_i32_0 : i32, i32
  }
  func.func @transform_8(%arg0: i32) -> (i32, i32, i32) {
    %c0_i32 = arith.constant 0 : i32
    %c0_i32_0 = arith.constant 0 : i32
    %c0_i32_1 = arith.constant 0 : i32
    return %arg0, %c0_i32, %c0_i32_0 : i32, i32, i32
  }
}

</mosaic_0001>

<bundles_post_ra>
// kernel: hybrid_ode_forward.1
= control target key start
LH: loop header
LB: loop body
LE: loop exit
PB: predicated region body
PF: predicated region fallthrough
CT: control target
= control target key end

     0   :  { %13 = vsyncpa [#allocation4], 0  ;;  %s2994_s27 = smov 0   ;;  %s3537_s0 = inlined_call_operand.vmem [shape: f32[4], index: 0, kind: input, shape index: {}]   ;;  %s3538_s1 = inlined_call_operand.vmem [shape: f32[8,128], index: 1, kind: input, shape index: {}]   ;;  %s3539_s2 = inlined_call_operand.vmem [shape: f32[128,96], index: 2, kind: input, shape index: {}]   ;;  %s3540_s3 = inlined_call_operand.vmem [shape: f32[1,96], index: 3, kind: input, shape index: {}]   ;;  %s3541_s4 = inlined_call_operand.vmem [shape: f32[32,96], index: 4, kind: input, shape index: {}]   ;;  %s3542_s5 = inlined_call_operand.vmem [shape: f32[1,96], index: 5, kind: input, shape index: {}]   ;;  %s3543_s6 = inlined_call_operand.vmem [shape: f32[32,128], index: 6, kind: input, shape index: {}]   ;;  %s3544_s7 = inlined_call_operand.vmem [shape: f32[1,128], index: 7, kind: input, shape index: {}]   ;;  %s3545_s8 = inlined_call_operand.vmem [shape: f32[4,8,128], index: 8, kind: output, shape index: {}]  }
   0x1 LB: > { %s3000_s28 = sadd.s32 4294967295, %s2933_s27   ;;  %p2009_p0 = scmp.ge.s32.totalorder %s2933_s27, 1  ;;  %s2933_s27 = sphi %s2994_s27, %s19_s27  }
   0x2   : > { %p218_p1 = scmp.lt.s32.totalorder %s2933_s27, 5  ;;  %s231_s9 = sshll.u32 %s3537_s0, 4  ;;  %s232_s9 = int_to_ptr.vmem [resolvable:$true] %s231_s9 }
   0x3   : > { %p2772_p4 = scmp.eq.s32.totalorder %s3000_s28, 0  ;;  %s2900_s11 = scalar_lea.vmem %s232_s9, 16 }
   0x4   : > { %p3008_p3 = pnand %p2009_p0, %p218_p1  ;;  %p2901_p7 = scmp.ne.s32.totalorder %s232_s9, %s2900_s11 }
   0x5   : > { %p2908_p11 = scmp.lt.s32.totalorder %s232_s9, %s232_s9  ;;  %p2909_p12 = scmp.lt.s32.totalorder %s2900_s11, %s2900_s11 }
   0x6   : > { %p2768_p5 = pneg %p3008_p3 }
   0x7   : > { %p2910_p13 = por %p2909_p12, %p2908_p11 }
   0x8   : > { %p2769_p6 = pnand %p2772_p4, %p2768_p5 }
   0xa   : > { %p2902_p8 = pneg %p2769_p6 }
   0xc   : > { %p2903_p9 = pnand %p2902_p8, %p2901_p7 }
   0xe   : > { %p2904_p10 = pneg %p2903_p9 }
  0x10   : > { %p2911_p2 = pnand %p2910_p13, %p2904_p10 }
  0x12   : > { %2914 = shalt.err (!%p2911_p2)
}
  0x13   : > { %s2943_s12 = smov [#allocation3]   ;;  %265 = sbr.rel (%p3008_p3) target bundleno = 8434 (0x20f2), region = 52 }
  0x14   : > { %2771 = dma.vmem_to_smem (!%p2769_p6), %s232_s9, 16, %s2943_s12, [#allocation4]  }
  0x1a   : > { %2928 = dma.done.wait (%p2772_p4), [#allocation4], 16  }
  0x1b   : > { %2930 = vsyncadd (%p2772_p4), [#allocation4], 4294967280 }
  0x1c   : > { %271 = sfence }
  0x1d   : > { %p294_p0 = scmp.lt.s32.totalorder %s3000_s28, 3  ;;  %p3547_p1 = scmp.ne.s32.totalorder %s3000_s28, 0 }
  0x1e   : > { %v302_v0 = vld [vmem:[%s3538_s1] sm:$0xff] (!%p3547_p1) }
  0x1f   : > { %s295_s13 = scalar_select %p294_p0, %s3000_s28, 3 }
  0x20   : > { %301 = sbr.rel (%p3547_p1) target bundleno = 39 (0x27), region = 60  ;;  %303 = vst [vmem:[#allocation2] sm:$0xff] (!%p3547_p1), %v302_v0 }
  0x21   : > { %s2013_s14 = sshll.u32 %s295_s13, 3 }
  0x22   : > { %s3028_s17 = scalar_lea.vmem %s3545_s8, %s2013_s14 }
  0x27 PF: > { %v3038_v1 = vld [vmem:[%s3539_s2] sm:$0xff]  ;;  %v3043_v2 = vld [vmem:[%s3539_s2 + $0x8] sm:$0xff]  ;;  %v3048_v3 = vld [vmem:[%s3539_s2 + $0x10] sm:$0xff]  ;;  %s3051_s26 = sld [smem:[#allocation3 + %s3000_s28]]  ;;  %s3175_s16 = smov 0  }
  0x28   : > { %v3056_v4 = vld [vmem:[%s3539_s2 + $0x18] sm:$0xff]  ;;  %v3061_v5 = vld [vmem:[%s3539_s2 + $0x20] sm:$0xff]  ;;  %v3066_v6 = vld [vmem:[%s3539_s2 + $0x28] sm:$0xff] }
  0x29   : > { %v3071_v7 = vld [vmem:[%s3539_s2 + $0x30] sm:$0xff]  ;;  %v3076_v8 = vld [vmem:[%s3539_s2 + $0x38] sm:$0xff]  ;;  %v3081_v9 = vld [vmem:[%s3539_s2 + $0x40] sm:$0xff] }
  0x2a   : > { %v3086_v10 = vld [vmem:[%s3539_s2 + $0x48] sm:$0xff]  ;;  %v3091_v11 = vld [vmem:[%s3539_s2 + $0x50] sm:$0xff]  ;;  %v3096_v12 = vld [vmem:[%s3539_s2 + $0x58] sm:$0xff] }
  0x2b   : > { %v3101_v13 = vld [vmem:[%s3539_s2 + $0x60] sm:$0xff]  ;;  %v3106_v14 = vld [vmem:[%s3539_s2 + $0x68] sm:$0xff]  ;;  %v3111_v15 = vld [vmem:[%s3539_s2 + $0x70] sm:$0xff] }
  0x2c   : > { %v3116_v16 = vld [vmem:[%s3539_s2 + $0x78] sm:$0xff]  ;;  %v3121_v17 = vld [vmem:[%s3540_s3] ss:$0 sm:$0xff]  ;;  %v3131_v19 = vld [vmem:[%s3541_s4 + $0x8] sm:$0xff] }
  0x2d   : > { %v3126_v18 = vld [vmem:[%s3541_s4] sm:$0xff]  ;;  %v3136_v20 = vld [vmem:[%s3541_s4 + $0x10] sm:$0xff]  ;;  %v3141_v21 = vld [vmem:[%s3541_s4 + $0x18] sm:$0xff] }
  0x2e   : > { %v3146_v22 = vld [vmem:[%s3542_s5] ss:$0 sm:$0xff]  ;;  %v3156_v24 = vld [vmem:[%s3543_s6 + $0x8] sm:$0xff]  ;;  %v3161_v25 = vld [vmem:[%s3543_s6 + $0x10] sm:$0xff] }
  0x2f   : > { %v3151_v23 = vld [vmem:[%s3543_s6] sm:$0xff]  ;;  %v3166_v26 = vld [vmem:[%s3543_s6 + $0x18] sm:$0xff] }
  0x30   : > { %v3171_v27 = vld [vmem:[%s3544_s7] ss:$0 sm:$0xff] }
  0x31   : > { %v332_v28 = vld [vmem:[#allocation2] sm:$0xff]  }
  0x32 LB: >> { %v3185_v29 = vpack.c.bf16 %v3043_v2, %v3038_v1  ;;  %v2944_v30 = vmov 0.0|0.0   ;;  %v3191_v31 = vpack.c.bf16 %v3056_v4, %v3048_v3  ;;  %vm2945_vm0 = vmmov 0   ;;  %s2947_s18 = smov 96   ;;  %s2948_s19 = smov 64   ;;  %s2941_s16 = sphi %s3175_s16, %s338_s16   ;;  %v2937_v28 = vphi %v332_v28, %v3548_v28  }
  0x33   : >> { %2548 = vmatprep.subr.bf16.mxu0 %v2944_v30  ;;  %2572 = vmatprep.subr.bf16.mxu1 %v2944_v30  ;;  %v2946_v32 = vmov 0.0   ;;  %v3202_v33 = vpack.c.bf16 %v3066_v6, %v3061_v5  ;;  %v3208_v34 = vpack.c.bf16 %v3076_v8, %v3071_v7  ;;  %v3214_v35 = vpack.c.bf16 %v3086_v10, %v3081_v9  ;;  %s338_s16 = sadd.s32 1, %s2941_s16  }
  0x34   : >> { %2550 = vmatpush3.bf16.msra.mxu0 %v3185_v29  ;;  %2238 = vmatprep.mubr.msk.f32.mxu0 %vm2945_vm0, %v2946_v32  ;;  %v3220_v36 = vpack.c.bf16 %v3096_v12, %v3091_v11  ;;  %v3226_v37 = vpack.c.bf16 %v3106_v14, %v3101_v13  ;;  %v3232_v38 = vpack.c.bf16 %v3116_v16, %v3111_v15  ;;  %vm443_vm1 = vcmask 261120   ;;  %p335_p2 = scmp.ge.s32.totalorder %s338_s16, 4  }
  0x35   : >> { %2551 = vmatprep.subr.bf16.mxu0 %v2944_v30  ;;  %2249 = vmatprep.mubr.msk.f32.mxu1 %vm2945_vm0, %v2946_v32  ;;  %v3244_v49 = vpack.c.bf16 %v3131_v19, %v3126_v18  ;;  %v3249_v50 = vpack.c.bf16 %v3141_v21, %v3136_v20 }
  0x37   : >> { %2574 = vmatpush3.bf16.msra.mxu1 %v3244_v49 }
  0x38   : >> { %2553 = vmatpush3.bf16.msra.mxu0 %v3191_v31  ;;  %2575 = vmatprep.subr.bf16.mxu1 %v2944_v30 }
  0x39   : >> { %2554 = vmatprep.subr.bf16.mxu0 %v2944_v30 }
  0x3b   : >> { %2577 = vmatpush3.bf16.msra.mxu1 %v3249_v50 }
  0x3c   : >> { %2556 = vmatpush3.bf16.msra.mxu0 %v3202_v33  ;;  %2578 = vmatprep.subr.bf16.mxu1 %v2944_v30 }
  0x3d   : >> { %2557 = vmatprep.subr.bf16.mxu0 %v2944_v30 }
  0x40   : >> { %2559 = vmatpush3.bf16.msra.mxu0 %v3208_v34 }
  0x41   : >> { %2560 = vmatprep.subr.bf16.mxu0 %v2944_v30 }
  0x44   : >> { %2562 = vmatpush3.bf16.msra.mxu0 %v3214_v35 }
  0x45   : >> { %2563 = vmatprep.subr.bf16.mxu0 %v2944_v30 }
  0x48   : >> { %2565 = vmatpush3.bf16.msra.mxu0 %v3220_v36 }
  0x49   : >> { %2566 = vmatprep.subr.bf16.mxu0 %v2944_v30 }
  0x4c   : >> { %2568 = vmatpush3.bf16.msra.mxu0 %v3226_v37 }
  0x4d   : >> { %2569 = vmatprep.subr.bf16.mxu0 %v2944_v30 }
  0x50   : >> { %2571 = vmatpush3.bf16.msra.mxu0 %v3232_v38 }
  0x51   : >> { %2608 = vmatprep.subr.bf16.mxu0 %v2944_v30 }
  0x53   : >> { %2239 = vmatmul.mubr.f32.vlgmr.msra.gmra.mrb[0].mxu0 %v2937_v28 }
  0x54   : >> { %2306 = vmatprep.mubr.msk.f32.mxu0 %vm2945_vm0, %v2946_v32  ;;  %2610 = vmatpush3.bf16.msra.mxu0 %v3244_v49 }
  0x55   : >> { %2611 = vmatprep.subr.bf16.mxu0 %v2944_v30 }
  0x58   : >> { %2613 = vmatpush3.bf16.msra.mxu0 %v3249_v50 }
  0x59   : >> { %2614 = vmatprep.subr.bf16.mxu0 %v2944_v30 }
 0x126   : >> { %v412_v39 = vpop.f32.mrb[0].mxu0 }
 0x127   : >> { %v413_v40 = vadd.f32 %v3121_v17, %v412_v39  ;;  %v2240_v41 = vpop.f32.mrb[1].mxu0  ;;  %v3267_v39 = vpack.c.bf16 %v3156_v24, %v3151_v23 }
 0x129   : >> { %2804 = vtanh.f32 %v413_v40  ;;  %v2016_v43 = vmul.f32 -1.442695, %v413_v40  ;;  %v3272_v40 = vpack.c.bf16 %v3166_v26, %v3161_v25 }
 0x12b   : >> { %2806 = vpow2.f32 %v2016_v43 }
 0x133   : >> { %v2805_v42 = vpop.eup %2804 }
 0x134   : >> { %424 = vrot.lane.b32.xlu0 %v2805_v42, %s2947_s18 }
 0x135   : >> { %v2807_v44 = vpop.eup %2806 }
 0x136   : >> { %v419_v45 = vadd.f32 1.0, %v2807_v44 }
 0x138   : >> { %2808 = vrcp.f32 %v419_v45 }
 0x142   : >> { %v2809_v46 = vpop.eup %2808 }
 0x1a6   : >> { %v425_v47 = vpop.permute.xlu0 %424 }
 0x1a7   : >> { %v427_v48 = vmul.f32 %v2809_v46, %v425_v47 }
 0x1a9   : >> { %2810 = vtanh.f32 %v427_v48  ;;  %v3302_v48 = vstv %s3051_s26 }
 0x1b3   : >> { %v2811_v51 = vpop.eup %2810 }
 0x1b4   : >> { %430 = vrot.lane.b32.xlu0 %v2811_v51, %s2948_s19 }
 0x226   : >> { %v431_v52 = vpop.permute.xlu0 %430 }
 0x227   : >> { %v433_v53 = vmul.f32 %v2809_v46, %v431_v52 }
 0x229   : >> { %441 = vrot.lane.b32.xlu1 %v433_v53, %s2948_s19 }
 0x29b   : >> { %v442_v54 = vpop.permute.xlu1 %441 }
 0x29c   : >> { %2250 = vmatmul.mubr.msk.f32.vlgmr.msra.gmra.mrb[0].mxu1 %vm443_vm1, %v442_v54 }
 0x29d   : >> { %2260 = vmatprep.mubr.msk.f32.mxu1 %vm2945_vm0, %v2946_v32  ;;  %2580 = vmatpush3.bf16.msra.mxu1 %v3267_v39 }
 0x29e   : >> { %2581 = vmatprep.subr.bf16.mxu1 %v2944_v30 }
 0x2a1   : >> { %2583 = vmatpush3.bf16.msra.mxu1 %v3272_v40 }
 0x2a2   : >> { %2584 = vmatprep.subr.bf16.mxu1 %v2944_v30 }
 0x36f   : >> { %v512_v55 = vpop.f32.mrb[0].mxu1 }
 0x370   : >> { %v513_v56 = vadd.f32 %v3146_v22, %v512_v55  ;;  %v2251_v57 = vpop.f32.mrb[1].mxu1 }
 0x372   : >> { %2812 = vtanh.f32 %v513_v56  ;;  %v2019_v59 = vmul.f32 -1.442695, %v513_v56 }
 0x374   : >> { %2814 = vpow2.f32 %v2019_v59 }
 0x37c   : >> { %v2813_v58 = vpop.eup %2812 }
 0x37d   : >> { %524 = vrot.lane.b32.xlu1 %v2813_v58, %s2947_s18 }
 0x37e   : >> { %v2815_v60 = vpop.eup %2814 }
 0x37f   : >> { %v519_v61 = vadd.f32 1.0, %v2815_v60 }
 0x381   : >> { %2816 = vrcp.f32 %v519_v61 }
 0x38b   : >> { %v2817_v62 = vpop.eup %2816 }
 0x3ef   : >> { %v525_v63 = vpop.permute.xlu1 %524 }
 0x3f0   : >> { %v527_v0 = vmul.f32 %v2817_v62, %v525_v63 }
 0x3f2   : >> { %2818 = vtanh.f32 %v527_v0 }
 0x3fc   : >> { %v2819_v41 = vpop.eup %2818 }
 0x3fd   : >> { %530 = vrot.lane.b32.xlu0 %v2819_v41, %s2948_s19 }
 0x46f   : >> { %v531_v42 = vpop.permute.xlu0 %530 }
 0x470   : >> { %v533_v43 = vmul.f32 %v2817_v62, %v531_v42 }
 0x472   : >> { %541 = vrot.lane.b32.xlu1 %v533_v43, %s2948_s19 }
 0x4e4   : >> { %v542_v44 = vpop.permute.xlu1 %541 }
 0x4e5   : >> { %2261 = vmatmul.mubr.msk.f32.vlgmr.msra.gmra.mrb[2].mxu1 %vm443_vm1, %v542_v44 }
 0x4e6   : >> { %2586 = vmatpush3.bf16.msra.mxu1 %v3185_v29  ;;  %2295 = vmatprep.mubr.msk.f32.mxu1 %vm2945_vm0, %v2946_v32 }
 0x4e7   : >> { %2587 = vmatprep.subr.bf16.mxu1 %v2944_v30 }
 0x4ea   : >> { %2589 = vmatpush3.bf16.msra.mxu1 %v3191_v31 }
 0x4eb   : >> { %2590 = vmatprep.subr.bf16.mxu1 %v2944_v30 }
 0x4ee   : >> { %2592 = vmatpush3.bf16.msra.mxu1 %v3202_v33 }
 0x4ef   : >> { %2593 = vmatprep.subr.bf16.mxu1 %v2944_v30 }
 0x4f2   : >> { %2595 = vmatpush3.bf16.msra.mxu1 %v3208_v34 }
 0x4f3   : >> { %2596 = vmatprep.subr.bf16.mxu1 %v2944_v30 }
 0x4f6   : >> { %2598 = vmatpush3.bf16.msra.mxu1 %v3214_v35 }
 0x4f7   : >> { %2599 = vmatprep.subr.bf16.mxu1 %v2944_v30 }
 0x4fa   : >> { %2601 = vmatpush3.bf16.msra.mxu1 %v3220_v36 }
 0x4fb   : >> { %2602 = vmatprep.subr.bf16.mxu1 %v2944_v30 }
 0x4fe   : >> { %2604 = vmatpush3.bf16.msra.mxu1 %v3226_v37 }
 0x4ff   : >> { %2605 = vmatprep.subr.bf16.mxu1 %v2944_v30 }
 0x502   : >> { %2607 = vmatpush3.bf16.msra.mxu1 %v3232_v38 }
 0x503   : >> { %2644 = vmatprep.subr.bf16.mxu1 %v2944_v30 }
 0x5b8   : >> { %v611_v45 = vpop.f32.mrb[2].mxu1 }
 0x5b9   : >> { %v3299_v46 = vadd.f32 %v3171_v27, %v611_v45  ;;  %v2262_v47 = vpop.f32.mrb[3].mxu1 }
 0x5bb   : >> { %v615_v51 = vmul.f32 0.161, %v3299_v46 }
 0x5bd   : >> { %v617_v52 = vmul.f32 %v3302_v48, %v615_v51 }
 0x5bf   : >> { %v618_v53 = vadd.f32 %v2937_v28, %v617_v52 }
 0x5c1   : >> { %2296 = vmatmul.mubr.f32.vlgmr.msra.gmra.mrb[4].mxu1 %v618_v53 }
 0x5c2   : >> { %2646 = vmatpush3.bf16.msra.mxu1 %v3244_v49  ;;  %2363 = vmatprep.mubr.msk.f32.mxu1 %vm2945_vm0, %v2946_v32 }
 0x5c3   : >> { %2647 = vmatprep.subr.bf16.mxu1 %v2944_v30 }
 0x5c6   : >> { %2649 = vmatpush3.bf16.msra.mxu1 %v3249_v50 }
 0x5c7   : >> { %2650 = vmatprep.subr.bf16.mxu1 %v2944_v30 }
 0x694   : >> { %v685_v54 = vpop.f32.mrb[4].mxu1 }
 0x695   : >> { %v686_v55 = vadd.f32 %v3121_v17, %v685_v54  ;;  %v2297_v56 = vpop.f32.mrb[5].mxu1 }
 0x697   : >> { %2820 = vtanh.f32 %v686_v55  ;;  %v2022_v58 = vmul.f32 -1.442695, %v686_v55 }
 0x699   : >> { %2822 = vpow2.f32 %v2022_v58 }
 0x6a1   : >> { %v2821_v57 = vpop.eup %2820 }
 0x6a2   : >> { %697 = vrot.lane.b32.xlu0 %v2821_v57, %s2947_s18 }
 0x6a3   : >> { %v2823_v59 = vpop.eup %2822 }
 0x6a4   : >> { %v692_v60 = vadd.f32 1.0, %v2823_v59 }
 0x6a6   : >> { %2824 = vrcp.f32 %v692_v60 }
 0x6b0   : >> { %v2825_v61 = vpop.eup %2824 }
 0x714   : >> { %v698_v62 = vpop.permute.xlu0 %697 }
 0x715   : >> { %v700_v63 = vmul.f32 %v2825_v61, %v698_v62 }
 0x717   : >> { %2826 = vtanh.f32 %v700_v63 }
 0x721   : >> { %v2827_v0 = vpop.eup %2826 }
 0x722   : >> { %703 = vrot.lane.b32.xlu1 %v2827_v0, %s2948_s19 }
 0x794   : >> { %v704_v41 = vpop.permute.xlu1 %703 }
 0x795   : >> { %v706_v42 = vmul.f32 %v2825_v61, %v704_v41  ;;  %v875_v41 = vmul.f32 -0.008480655, %v3299_v46 }
 0x797   : >> { %708 = vrot.lane.b32.xlu0 %v706_v42, %s2948_s19  ;;  %v1136_v42 = vmul.f32 2.8971531, %v3299_v46 }
 0x809   : >> { %v709_v43 = vpop.permute.xlu0 %708 }
 0x80a   : >> { %2307 = vmatmul.mubr.msk.f32.vlgmr.msra.gmra.mrb[2].mxu0 %vm443_vm1, %v709_v43  ;;  %v1399_v43 = vmul.f32 5.325865, %v3299_v46 }
 0x80b   : >> { %2616 = vmatpush3.bf16.msra.mxu0 %v3267_v39  ;;  %2317 = vmatprep.mubr.msk.f32.mxu0 %vm2945_vm0, %v2946_v32 }
 0x80c   : >> { %2617 = vmatprep.subr.bf16.mxu0 %v2944_v30 }
 0x80f   : >> { %2619 = vmatpush3.bf16.msra.mxu0 %v3272_v40 }
 0x810   : >> { %2620 = vmatprep.subr.bf16.mxu0 %v2944_v30 }
 0x8dd   : >> { %v778_v44 = vpop.f32.mrb[2].mxu0 }
 0x8de   : >> { %v779_v45 = vadd.f32 %v3146_v22, %v778_v44  ;;  %v2308_v47 = vpop.f32.mrb[3].mxu0  ;;  %v1664_v44 = vmul.f32 5.8614554, %v3299_v46 }
 0x8e0   : >> { %2828 = vtanh.f32 %v779_v45  ;;  %v2024_v52 = vmul.f32 -1.442695, %v779_v45 }
 0x8e2   : >> { %2830 = vpow2.f32 %v2024_v52 }
 0x8ea   : >> { %v2829_v51 = vpop.eup %2828 }
 0x8eb   : >> { %790 = vrot.lane.b32.xlu1 %v2829_v51, %s2947_s18 }
 0x8ec   : >> { %v2831_v53 = vpop.eup %2830 }
 0x8ed   : >> { %v785_v54 = vadd.f32 1.0, %v2831_v53  ;;  %v1931_v53 = vmul.f32 0.09646077, %v3299_v46 }
 0x8ef   : >> { %2832 = vrcp.f32 %v785_v54 }
 0x8f9   : >> { %v2833_v55 = vpop.eup %2832 }
 0x95d   : >> { %v791_v56 = vpop.permute.xlu1 %790 }
 0x95e   : >> { %v793_v57 = vmul.f32 %v2833_v55, %v791_v56 }
 0x960   : >> { %2834 = vtanh.f32 %v793_v57 }
 0x96a   : >> { %v2835_v58 = vpop.eup %2834 }
 0x96b   : >> { %796 = vrot.lane.b32.xlu0 %v2835_v58, %s2948_s19 }
 0x9dd   : >> { %v797_v59 = vpop.permute.xlu0 %796 }
 0x9de   : >> { %v799_v60 = vmul.f32 %v2833_v55, %v797_v59 }
 0x9e0   : >> { %801 = vrot.lane.b32.xlu1 %v799_v60, %s2948_s19 }
 0xa52   : >> { %v802_v61 = vpop.permute.xlu1 %801 }
 0xa53   : >> { %2318 = vmatmul.mubr.msk.f32.vlgmr.msra.gmra.mrb[4].mxu0 %vm443_vm1, %v802_v61 }
 0xa54   : >> { %2622 = vmatpush3.bf16.msra.mxu0 %v3185_v29  ;;  %2352 = vmatprep.mubr.msk.f32.mxu0 %vm2945_vm0, %v2946_v32 }
 0xa55   : >> { %2623 = vmatprep.subr.bf16.mxu0 %v2944_v30 }
 0xa58   : >> { %2625 = vmatpush3.bf16.msra.mxu0 %v3191_v31 }
 0xa59   : >> { %2626 = vmatprep.subr.bf16.mxu0 %v2944_v30 }
 0xa5c   : >> { %2628 = vmatpush3.bf16.msra.mxu0 %v3202_v33 }
 0xa5d   : >> { %2629 = vmatprep.subr.bf16.mxu0 %v2944_v30 }
 0xa60   : >> { %2631 = vmatpush3.bf16.msra.mxu0 %v3208_v34 }
 0xa61   : >> { %2632 = vmatprep.subr.bf16.mxu0 %v2944_v30 }
 0xa64   : >> { %2634 = vmatpush3.bf16.msra.mxu0 %v3214_v35 }
 0xa65   : >> { %2635 = vmatprep.subr.bf16.mxu0 %v2944_v30 }
 0xa68   : >> { %2637 = vmatpush3.bf16.msra.mxu0 %v3220_v36 }
 0xa69   : >> { %2638 = vmatprep.subr.bf16.mxu0 %v2944_v30 }
 0xa6c   : >> { %2640 = vmatpush3.bf16.msra.mxu0 %v3226_v37 }
 0xa6d   : >> { %2641 = vmatprep.subr.bf16.mxu0 %v2944_v30 }
 0xa70   : >> { %2643 = vmatpush3.bf16.msra.mxu0 %v3232_v38 }
 0xa71   : >> { %2680 = vmatprep.subr.bf16.mxu0 %v2944_v30 }
 0xb26   : >> { %v871_v62 = vpop.f32.mrb[4].mxu0 }
 0xb27   : >> { %v872_v63 = vadd.f32 %v3171_v27, %v871_v62  ;;  %v2319_v0 = vpop.f32.mrb[5].mxu0 }
 0xb29   : >> { %v876_v45 = vmul.f32 0.33548066, %v872_v63  ;;  %v1137_v47 = vmul.f32 -6.3594484, %v872_v63  ;;  %v1400_v51 = vmul.f32 -11.748883, %v872_v63 }
 0xb2a   : >> { %v1665_v52 = vmul.f32 -12.920969, %v872_v63  ;;  %v1932_v54 = vmul.f32 0.01, %v872_v63 }
 0xb2b   : >> { %v877_v55 = vadd.f32 %v876_v45, %v875_v41  ;;  %v3353_v56 = vadd.f32 %v1137_v47, %v1136_v42  ;;  %v3355_v57 = vadd.f32 %v1400_v51, %v1399_v43 }
 0xb2c   : >> { %v3357_v58 = vadd.f32 %v1665_v52, %v1664_v44  ;;  %v3359_v59 = vadd.f32 %v1932_v54, %v1931_v53 }
 0xb2d   : >> { %v878_v60 = vmul.f32 %v877_v55, %v3302_v48 }
 0xb2f   : >> { %v879_v61 = vadd.f32 %v2937_v28, %v878_v60 }
 0xb31   : >> { %2353 = vmatmul.mubr.f32.vlgmr.msra.gmra.mrb[6].mxu0 %v879_v61 }
 0xb32   : >> { %2682 = vmatpush3.bf16.msra.mxu0 %v3244_v49  ;;  %2420 = vmatprep.mubr.msk.f32.mxu0 %vm2945_vm0, %v2946_v32 }
 0xb33   : >> { %2683 = vmatprep.subr.bf16.mxu0 %v2944_v30 }
 0xb36   : >> { %2685 = vmatpush3.bf16.msra.mxu0 %v3249_v50 }
 0xb37   : >> { %2686 = vmatprep.subr.bf16.mxu0 %v2944_v30 }
 0xc04   : >> { %v946_v46 = vpop.f32.mrb[6].mxu0 }
 0xc05   : >> { %v947_v62 = vadd.f32 %v3121_v17, %v946_v46  ;;  %v2354_v63 = vpop.f32.mrb[7].mxu0 }
 0xc07   : >> { %2836 = vtanh.f32 %v947_v62  ;;  %v2026_v41 = vmul.f32 -1.442695, %v947_v62 }
 0xc09   : >> { %2838 = vpow2.f32 %v2026_v41 }
 0xc11   : >> { %v2837_v0 = vpop.eup %2836 }
 0xc12   : >> { %958 = vrot.lane.b32.xlu0 %v2837_v0, %s2947_s18 }
 0xc13   : >> { %v2839_v42 = vpop.eup %2838 }
 0xc14   : >> { %v953_v43 = vadd.f32 1.0, %v2839_v42 }
 0xc16   : >> { %2840 = vrcp.f32 %v953_v43 }
 0xc20   : >> { %v2841_v44 = vpop.eup %2840 }
 0xc84   : >> { %v959_v45 = vpop.permute.xlu0 %958 }
 0xc85   : >> { %v961_v47 = vmul.f32 %v2841_v44, %v959_v45 }
 0xc87   : >> { %2842 = vtanh.f32 %v961_v47 }
 0xc91   : >> { %v2843_v51 = vpop.eup %2842 }
 0xc92   : >> { %964 = vrot.lane.b32.xlu1 %v2843_v51, %s2948_s19 }
 0xd04   : >> { %v965_v52 = vpop.permute.xlu1 %964 }
 0xd05   : >> { %v967_v53 = vmul.f32 %v2841_v44, %v965_v52 }
 0xd07   : >> { %969 = vrot.lane.b32.xlu0 %v967_v53, %s2948_s19 }
 0xd79   : >> { %v970_v54 = vpop.permute.xlu0 %969 }
 0xd7a   : >> { %2364 = vmatmul.mubr.msk.f32.vlgmr.msra.gmra.mrb[6].mxu1 %vm443_vm1, %v970_v54 }
 0xd7b   : >> { %2652 = vmatpush3.bf16.msra.mxu1 %v3267_v39  ;;  %2374 = vmatprep.mubr.msk.f32.mxu1 %vm2945_vm0, %v2946_v32 }
 0xd7c   : >> { %2653 = vmatprep.subr.bf16.mxu1 %v2944_v30 }
 0xd7f   : >> { %2655 = vmatpush3.bf16.msra.mxu1 %v3272_v40 }
 0xd80   : >> { %2656 = vmatprep.subr.bf16.mxu1 %v2944_v30 }
 0xe4d   : >> { %v1039_v55 = vpop.f32.mrb[6].mxu1 }
 0xe4e   : >> { %v1040_v60 = vadd.f32 %v3146_v22, %v1039_v55  ;;  %v2365_v61 = vpop.f32.mrb[7].mxu1 }
 0xe50   : >> { %2844 = vtanh.f32 %v1040_v60  ;;  %v2028_v62 = vmul.f32 -1.442695, %v1040_v60 }
 0xe52   : >> { %2846 = vpow2.f32 %v2028_v62 }
 0xe5a   : >> { %v2845_v46 = vpop.eup %2844 }
 0xe5b   : >> { %1051 = vrot.lane.b32.xlu1 %v2845_v46, %s2947_s18 }
 0xe5c   : >> { %v2847_v63 = vpop.eup %2846 }
 0xe5d   : >> { %v1046_v0 = vadd.f32 1.0, %v2847_v63 }
 0xe5f   : >> { %2848 = vrcp.f32 %v1046_v0 }
 0xe69   : >> { %v2849_v41 = vpop.eup %2848 }
 0xecd   : >> { %v1052_v42 = vpop.permute.xlu1 %1051 }
 0xece   : >> { %v1054_v43 = vmul.f32 %v2849_v41, %v1052_v42 }
 0xed0   : >> { %2850 = vtanh.f32 %v1054_v43 }
 0xeda   : >> { %v2851_v44 = vpop.eup %2850 }
 0xedb   : >> { %1057 = vrot.lane.b32.xlu0 %v2851_v44, %s2948_s19 }
 0xf4d   : >> { %v1058_v45 = vpop.permute.xlu0 %1057 }
 0xf4e   : >> { %v1060_v47 = vmul.f32 %v2849_v41, %v1058_v45 }
 0xf50   : >> { %1062 = vrot.lane.b32.xlu1 %v1060_v47, %s2948_s19 }
 0xfc2   : >> { %v1063_v51 = vpop.permute.xlu1 %1062 }
 0xfc3   : >> { %2375 = vmatmul.mubr.msk.f32.vlgmr.msra.gmra.mrb[8].mxu1 %vm443_vm1, %v1063_v51 }
 0xfc4   : >> { %2658 = vmatpush3.bf16.msra.mxu1 %v3185_v29  ;;  %2409 = vmatprep.mubr.msk.f32.mxu1 %vm2945_vm0, %v2946_v32 }
 0xfc5   : >> { %2659 = vmatprep.subr.bf16.mxu1 %v2944_v30 }
 0xfc8   : >> { %2661 = vmatpush3.bf16.msra.mxu1 %v3191_v31 }
 0xfc9   : >> { %2662 = vmatprep.subr.bf16.mxu1 %v2944_v30 }
 0xfcc   : >> { %2664 = vmatpush3.bf16.msra.mxu1 %v3202_v33 }
 0xfcd   : >> { %2665 = vmatprep.subr.bf16.mxu1 %v2944_v30 }
 0xfd0   : >> { %2667 = vmatpush3.bf16.msra.mxu1 %v3208_v34 }
 0xfd1   : >> { %2668 = vmatprep.subr.bf16.mxu1 %v2944_v30 }
 0xfd4   : >> { %2670 = vmatpush3.bf16.msra.mxu1 %v3214_v35 }
 0xfd5   : >> { %2671 = vmatprep.subr.bf16.mxu1 %v2944_v30 }
 0xfd8   : >> { %2673 = vmatpush3.bf16.msra.mxu1 %v3220_v36 }
 0xfd9   : >> { %2674 = vmatprep.subr.bf16.mxu1 %v2944_v30 }
 0xfdc   : >> { %2676 = vmatpush3.bf16.msra.mxu1 %v3226_v37 }
 0xfdd   : >> { %2677 = vmatprep.subr.bf16.mxu1 %v2944_v30 }
 0xfe0   : >> { %2679 = vmatpush3.bf16.msra.mxu1 %v3232_v38 }
 0xfe1   : >> { %2716 = vmatprep.subr.bf16.mxu1 %v2944_v30 }
0x1096   : >> { %v1132_v52 = vpop.f32.mrb[8].mxu1 }
0x1097   : >> { %v1133_v53 = vadd.f32 %v3171_v27, %v1132_v52  ;;  %v2376_v54 = vpop.f32.mrb[9].mxu1 }
0x1099   : >> { %v1139_v55 = vmul.f32 4.3622956, %v1133_v53  ;;  %v1402_v60 = vmul.f32 7.495539, %v1133_v53  ;;  %v1667_v61 = vmul.f32 8.159368, %v1133_v53 }
0x109a   : >> { %v1934_v46 = vmul.f32 0.47988966, %v1133_v53 }
0x109b   : >> { %v1140_v62 = vadd.f32 %v1139_v55, %v3353_v56  ;;  %v3406_v63 = vadd.f32 %v1402_v60, %v3355_v57  ;;  %v3409_v0 = vadd.f32 %v1667_v61, %v3357_v58 }
0x109c   : >> { %v3412_v41 = vadd.f32 %v1934_v46, %v3359_v59 }
0x109d   : >> { %v1141_v42 = vmul.f32 %v1140_v62, %v3302_v48 }
0x109f   : >> { %v1142_v43 = vadd.f32 %v2937_v28, %v1141_v42 }
0x10a1   : >> { %2410 = vmatmul.mubr.f32.vlgmr.msra.gmra.mrb[10].mxu1 %v1142_v43 }
0x10a2   : >> { %2718 = vmatpush3.bf16.msra.mxu1 %v3244_v49  ;;  %2477 = vmatprep.mubr.msk.f32.mxu1 %vm2945_vm0, %v2946_v32 }
0x10a3   : >> { %2719 = vmatprep.subr.bf16.mxu1 %v2944_v30 }
0x10a6   : >> { %2721 = vmatpush3.bf16.msra.mxu1 %v3249_v50 }
0x10a7   : >> { %2722 = vmatprep.subr.bf16.mxu1 %v2944_v30 }
0x1174   : >> { %v1209_v56 = vpop.f32.mrb[10].mxu1 }
0x1175   : >> { %v1210_v57 = vadd.f32 %v3121_v17, %v1209_v56  ;;  %v2411_v58 = vpop.f32.mrb[11].mxu1 }
0x1177   : >> { %2852 = vtanh.f32 %v1210_v57  ;;  %v2030_v44 = vmul.f32 -1.442695, %v1210_v57 }
0x1179   : >> { %2854 = vpow2.f32 %v2030_v44 }
0x1181   : >> { %v2853_v59 = vpop.eup %2852 }
0x1182   : >> { %1221 = vrot.lane.b32.xlu0 %v2853_v59, %s2947_s18 }
0x1183   : >> { %v2855_v45 = vpop.eup %2854 }
0x1184   : >> { %v1216_v47 = vadd.f32 1.0, %v2855_v45 }
0x1186   : >> { %2856 = vrcp.f32 %v1216_v47 }
0x1190   : >> { %v2857_v51 = vpop.eup %2856 }
0x11f4   : >> { %v1222_v52 = vpop.permute.xlu0 %1221 }
0x11f5   : >> { %v1224_v53 = vmul.f32 %v2857_v51, %v1222_v52 }
0x11f7   : >> { %2858 = vtanh.f32 %v1224_v53 }
0x1201   : >> { %v2859_v54 = vpop.eup %2858 }
0x1202   : >> { %1227 = vrot.lane.b32.xlu1 %v2859_v54, %s2948_s19 }
0x1274   : >> { %v1228_v55 = vpop.permute.xlu1 %1227 }
0x1275   : >> { %v1230_v60 = vmul.f32 %v2857_v51, %v1228_v55 }
0x1277   : >> { %1232 = vrot.lane.b32.xlu0 %v1230_v60, %s2948_s19 }
0x12e9   : >> { %v1233_v61 = vpop.permute.xlu0 %1232 }
0x12ea   : >> { %2421 = vmatmul.mubr.msk.f32.vlgmr.msra.gmra.mrb[8].mxu0 %vm443_vm1, %v1233_v61 }
0x12eb   : >> { %2688 = vmatpush3.bf16.msra.mxu0 %v3267_v39  ;;  %2431 = vmatprep.mubr.msk.f32.mxu0 %vm2945_vm0, %v2946_v32 }
0x12ec   : >> { %2689 = vmatprep.subr.bf16.mxu0 %v2944_v30 }
0x12ef   : >> { %2691 = vmatpush3.bf16.msra.mxu0 %v3272_v40 }
0x12f0   : >> { %2692 = vmatprep.subr.bf16.mxu0 %v2944_v30 }
0x13bd   : >> { %v1302_v46 = vpop.f32.mrb[8].mxu0 }
0x13be   : >> { %v1303_v62 = vadd.f32 %v3146_v22, %v1302_v46  ;;  %v2422_v42 = vpop.f32.mrb[9].mxu0 }
0x13c0   : >> { %2860 = vtanh.f32 %v1303_v62  ;;  %v2032_v56 = vmul.f32 -1.442695, %v1303_v62 }
0x13c2   : >> { %2862 = vpow2.f32 %v2032_v56 }
0x13ca   : >> { %v2861_v43 = vpop.eup %2860 }
0x13cb   : >> { %1314 = vrot.lane.b32.xlu1 %v2861_v43, %s2947_s18 }
0x13cc   : >> { %v2863_v57 = vpop.eup %2862 }
0x13cd   : >> { %v1309_v58 = vadd.f32 1.0, %v2863_v57 }
0x13cf   : >> { %2864 = vrcp.f32 %v1309_v58 }
0x13d9   : >> { %v2865_v59 = vpop.eup %2864 }
0x143d   : >> { %v1315_v44 = vpop.permute.xlu1 %1314 }
0x143e   : >> { %v1317_v45 = vmul.f32 %v2865_v59, %v1315_v44 }
0x1440   : >> { %2866 = vtanh.f32 %v1317_v45 }
0x144a   : >> { %v2867_v47 = vpop.eup %2866 }
0x144b   : >> { %1320 = vrot.lane.b32.xlu0 %v2867_v47, %s2948_s19 }
0x14bd   : >> { %v1321_v51 = vpop.permute.xlu0 %1320 }
0x14be   : >> { %v1323_v52 = vmul.f32 %v2865_v59, %v1321_v51 }
0x14c0   : >> { %1325 = vrot.lane.b32.xlu1 %v1323_v52, %s2948_s19 }
0x1532   : >> { %v1326_v53 = vpop.permute.xlu1 %1325 }
0x1533   : >> { %2432 = vmatmul.mubr.msk.f32.vlgmr.msra.gmra.mrb[10].mxu0 %vm443_vm1, %v1326_v53 }
0x1534   : >> { %2694 = vmatpush3.bf16.msra.mxu0 %v3185_v29  ;;  %2466 = vmatprep.mubr.msk.f32.mxu0 %vm2945_vm0, %v2946_v32 }
0x1535   : >> { %2695 = vmatprep.subr.bf16.mxu0 %v2944_v30 }
0x1538   : >> { %2697 = vmatpush3.bf16.msra.mxu0 %v3191_v31 }
0x1539   : >> { %2698 = vmatprep.subr.bf16.mxu0 %v2944_v30 }
0x153c   : >> { %2700 = vmatpush3.bf16.msra.mxu0 %v3202_v33 }
0x153d   : >> { %2701 = vmatprep.subr.bf16.mxu0 %v2944_v30 }
0x1540   : >> { %2703 = vmatpush3.bf16.msra.mxu0 %v3208_v34 }
0x1541   : >> { %2704 = vmatprep.subr.bf16.mxu0 %v2944_v30 }
0x1544   : >> { %2706 = vmatpush3.bf16.msra.mxu0 %v3214_v35 }
0x1545   : >> { %2707 = vmatprep.subr.bf16.mxu0 %v2944_v30 }
0x1548   : >> { %2709 = vmatpush3.bf16.msra.mxu0 %v3220_v36 }
0x1549   : >> { %2710 = vmatprep.subr.bf16.mxu0 %v2944_v30 }
0x154c   : >> { %2712 = vmatpush3.bf16.msra.mxu0 %v3226_v37 }
0x154d   : >> { %2713 = vmatprep.subr.bf16.mxu0 %v2944_v30 }
0x1550   : >> { %2715 = vmatpush3.bf16.msra.mxu0 %v3232_v38 }
0x1551   : >> { %2752 = vmatprep.subr.bf16.mxu0 %v2944_v30 }
0x1606   : >> { %v1395_v54 = vpop.f32.mrb[10].mxu0 }
0x1607   : >> { %v1396_v55 = vadd.f32 %v3171_v27, %v1395_v54  ;;  %v2433_v60 = vpop.f32.mrb[11].mxu0 }
0x1609   : >> { %v1404_v61 = vmul.f32 -0.09249507, %v1396_v55  ;;  %v1669_v46 = vmul.f32 -0.07158497, %v1396_v55  ;;  %v1936_v62 = vmul.f32 1.3790085, %v1396_v55 }
0x160b   : >> { %v1405_v42 = vadd.f32 %v1404_v61, %v3406_v63  ;;  %v3459_v43 = vadd.f32 %v1669_v46, %v3409_v0  ;;  %v3462_v56 = vadd.f32 %v1936_v62, %v3412_v41 }
0x160d   : >> { %v1406_v57 = vmul.f32 %v1405_v42, %v3302_v48 }
0x160f   : >> { %v1407_v58 = vadd.f32 %v2937_v28, %v1406_v57 }
0x1611   : >> { %2467 = vmatmul.mubr.f32.vlgmr.msra.gmra.mrb[12].mxu0 %v1407_v58 }
0x1612   : >> { %2754 = vmatpush3.bf16.msra.mxu0 %v3244_v49  ;;  %2534 = vmatprep.mubr.msk.f32.mxu0 %vm2945_vm0, %v2946_v32 }
0x1613   : >> { %2755 = vmatprep.subr.bf16.mxu0 %v2944_v30 }
0x1616   : >> { %2757 = vmatpush3.bf16.msra.mxu0 %v3249_v50 }
0x1617   : >> { %2758 = vmatprep.subr.bf16.mxu0 %v2944_v30 }
0x16e4   : >> { %v1474_v63 = vpop.f32.mrb[12].mxu0 }
0x16e5   : >> { %v1475_v0 = vadd.f32 %v3121_v17, %v1474_v63  ;;  %v2468_v41 = vpop.f32.mrb[13].mxu0 }
0x16e7   : >> { %2868 = vtanh.f32 %v1475_v0  ;;  %v2034_v44 = vmul.f32 -1.442695, %v1475_v0 }
0x16e9   : >> { %2870 = vpow2.f32 %v2034_v44 }
0x16f1   : >> { %v2869_v59 = vpop.eup %2868 }
0x16f2   : >> { %1486 = vrot.lane.b32.xlu0 %v2869_v59, %s2947_s18 }
0x16f3   : >> { %v2871_v49 = vpop.eup %2870 }
0x16f4   : >> { %v1481_v45 = vadd.f32 1.0, %v2871_v49 }
0x16f6   : >> { %2872 = vrcp.f32 %v1481_v45 }
0x1700   : >> { %v2873_v47 = vpop.eup %2872 }
0x1764   : >> { %v1487_v51 = vpop.permute.xlu0 %1486 }
0x1765   : >> { %v1489_v52 = vmul.f32 %v2873_v47, %v1487_v51 }
0x1767   : >> { %2874 = vtanh.f32 %v1489_v52 }
0x1771   : >> { %v2875_v50 = vpop.eup %2874 }
0x1772   : >> { %1492 = vrot.lane.b32.xlu1 %v2875_v50, %s2948_s19 }
0x17e4   : >> { %v1493_v53 = vpop.permute.xlu1 %1492 }
0x17e5   : >> { %v1495_v54 = vmul.f32 %v2873_v47, %v1493_v53 }
0x17e7   : >> { %1497 = vrot.lane.b32.xlu0 %v1495_v54, %s2948_s19 }
0x1859   : >> { %v1498_v55 = vpop.permute.xlu0 %1497 }
0x185a   : >> { %2478 = vmatmul.mubr.msk.f32.vlgmr.msra.gmra.mrb[12].mxu1 %vm443_vm1, %v1498_v55 }
0x185b   : >> { %2724 = vmatpush3.bf16.msra.mxu1 %v3267_v39  ;;  %2488 = vmatprep.mubr.msk.f32.mxu1 %vm2945_vm0, %v2946_v32 }
0x185c   : >> { %2725 = vmatprep.subr.bf16.mxu1 %v2944_v30 }
0x185f   : >> { %2727 = vmatpush3.bf16.msra.mxu1 %v3272_v40 }
0x1860   : >> { %2728 = vmatprep.subr.bf16.mxu1 %v2944_v30 }
0x192d   : >> { %v1567_v60 = vpop.f32.mrb[12].mxu1 }
0x192e   : >> { %v1568_v61 = vadd.f32 %v3146_v22, %v1567_v60  ;;  %v2479_v46 = vpop.f32.mrb[13].mxu1 }
0x1930   : >> { %2876 = vtanh.f32 %v1568_v61  ;;  %v2036_v42 = vmul.f32 -1.442695, %v1568_v61 }
0x1932   : >> { %2878 = vpow2.f32 %v2036_v42 }
0x193a   : >> { %v2877_v62 = vpop.eup %2876 }
0x193b   : >> { %1579 = vrot.lane.b32.xlu1 %v2877_v62, %s2947_s18 }
0x193c   : >> { %v2879_v57 = vpop.eup %2878 }
0x193d   : >> { %v1574_v58 = vadd.f32 1.0, %v2879_v57 }
0x193f   : >> { %2880 = vrcp.f32 %v1574_v58 }
0x1949   : >> { %v2881_v63 = vpop.eup %2880 }
0x19ad   : >> { %v1580_v0 = vpop.permute.xlu1 %1579 }
0x19ae   : >> { %v1582_v41 = vmul.f32 %v2881_v63, %v1580_v0 }
0x19b0   : >> { %2882 = vtanh.f32 %v1582_v41 }
0x19ba   : >> { %v2883_v59 = vpop.eup %2882 }
0x19bb   : >> { %1585 = vrot.lane.b32.xlu0 %v2883_v59, %s2948_s19 }
0x1a2d   : >> { %v1586_v44 = vpop.permute.xlu0 %1585 }
0x1a2e   : >> { %v1588_v49 = vmul.f32 %v2881_v63, %v1586_v44 }
0x1a30   : >> { %1590 = vrot.lane.b32.xlu1 %v1588_v49, %s2948_s19 }
0x1aa2   : >> { %v1591_v45 = vpop.permute.xlu1 %1590 }
0x1aa3   : >> { %2489 = vmatmul.mubr.msk.f32.vlgmr.msra.gmra.mrb[14].mxu1 %vm443_vm1, %v1591_v45 }
0x1aa4   : >> { %2730 = vmatpush3.bf16.msra.mxu1 %v3185_v29  ;;  %2523 = vmatprep.mubr.msk.f32.mxu1 %vm2945_vm0, %v2946_v32 }
0x1aa5   : >> { %2731 = vmatprep.subr.bf16.mxu1 %v2944_v30 }
0x1aa8   : >> { %2733 = vmatpush3.bf16.msra.mxu1 %v3191_v31 }
0x1aa9   : >> { %2734 = vmatprep.subr.bf16.mxu1 %v2944_v30 }
0x1aac   : >> { %2736 = vmatpush3.bf16.msra.mxu1 %v3202_v33 }
0x1aad   : >> { %2737 = vmatprep.subr.bf16.mxu1 %v2944_v30 }
0x1ab0   : >> { %2739 = vmatpush3.bf16.msra.mxu1 %v3208_v34 }
0x1ab1   : >> { %2740 = vmatprep.subr.bf16.mxu1 %v2944_v30 }
0x1ab4   : >> { %2742 = vmatpush3.bf16.msra.mxu1 %v3214_v35 }
0x1ab5   : >> { %2743 = vmatprep.subr.bf16.mxu1 %v2944_v30 }
0x1ab8   : >> { %2745 = vmatpush3.bf16.msra.mxu1 %v3220_v36 }
0x1ab9   : >> { %2746 = vmatprep.subr.bf16.mxu1 %v2944_v30 }
0x1abc   : >> { %2748 = vmatpush3.bf16.msra.mxu1 %v3226_v37 }
0x1abd   : >> { %2749 = vmatprep.subr.bf16.mxu1 %v2944_v30 }
0x1ac0   : >> { %2751 = vmatpush3.bf16.msra.mxu1 %v3232_v38 }
0x1b76   : >> { %v1660_v29 = vpop.f32.mrb[14].mxu1 }
0x1b77   : >> { %v1661_v31 = vadd.f32 %v3171_v27, %v1660_v29  ;;  %v2490_v33 = vpop.f32.mrb[15].mxu1 }
0x1b79   : >> { %v1671_v34 = vmul.f32 -0.02826905, %v1661_v31  ;;  %v1938_v47 = vmul.f32 -3.2900696, %v1661_v31 }
0x1b7b   : >> { %v1672_v35 = vadd.f32 %v1671_v34, %v3459_v43  ;;  %v1939_v51 = vadd.f32 %v1938_v47, %v3462_v56 }
0x1b7d   : >> { %v1673_v36 = vmul.f32 %v1672_v35, %v3302_v48 }
0x1b7f   : >> { %v1674_v52 = vadd.f32 %v2937_v28, %v1673_v36 }
0x1b81   : >> { %2524 = vmatmul.mubr.f32.vlgmr.msra.gmra.mrb[16].mxu1 %v1674_v52 }
0x1c54   : >> { %v1741_v37 = vpop.f32.mrb[16].mxu1 }
0x1c55   : >> { %v1742_v50 = vadd.f32 %v3121_v17, %v1741_v37  ;;  %v2525_v53 = vpop.f32.mrb[17].mxu1 }
0x1c57   : >> { %2884 = vtanh.f32 %v1742_v50  ;;  %v2038_v54 = vmul.f32 -1.442695, %v1742_v50 }
0x1c59   : >> { %2886 = vpow2.f32 %v2038_v54 }
0x1c61   : >> { %v2885_v38 = vpop.eup %2884 }
0x1c62   : >> { %1753 = vrot.lane.b32.xlu0 %v2885_v38, %s2947_s18 }
0x1c63   : >> { %v2887_v55 = vpop.eup %2886 }
0x1c64   : >> { %v1748_v60 = vadd.f32 1.0, %v2887_v55 }
0x1c66   : >> { %2888 = vrcp.f32 %v1748_v60 }
0x1c70   : >> { %v2889_v43 = vpop.eup %2888 }
0x1cd4   : >> { %v1754_v56 = vpop.permute.xlu0 %1753 }
0x1cd5   : >> { %v1756_v61 = vmul.f32 %v2889_v43, %v1754_v56 }
0x1cd7   : >> { %2890 = vtanh.f32 %v1756_v61 }
0x1ce1   : >> { %v2891_v46 = vpop.eup %2890 }
0x1ce2   : >> { %1759 = vrot.lane.b32.xlu1 %v2891_v46, %s2948_s19 }
0x1d54   : >> { %v1760_v62 = vpop.permute.xlu1 %1759 }
0x1d55   : >> { %v1762_v42 = vmul.f32 %v2889_v43, %v1760_v62 }
0x1d57   : >> { %1764 = vrot.lane.b32.xlu0 %v1762_v42, %s2948_s19 }
0x1dc9   : >> { %v1765_v57 = vpop.permute.xlu0 %1764 }
0x1dca   : >> { %2535 = vmatmul.mubr.msk.f32.vlgmr.msra.gmra.mrb[14].mxu0 %vm443_vm1, %v1765_v57 }
0x1dcb   : >> { %2760 = vmatpush3.bf16.msra.mxu0 %v3267_v39  ;;  %2545 = vmatprep.mubr.msk.f32.mxu0 %vm2945_vm0, %v2946_v32 }
0x1dcc   : >> { %2761 = vmatprep.subr.bf16.mxu0 %v2944_v30 }
0x1dcf   : >> { %2763 = vmatpush3.bf16.msra.mxu0 %v3272_v40 }
0x1e9d   : >> { %v1834_v58 = vpop.f32.mrb[14].mxu0 }
0x1e9e   : >> { %v1835_v63 = vadd.f32 %v3146_v22, %v1834_v58  ;;  %v2536_v0 = vpop.f32.mrb[15].mxu0 }
0x1ea0   : >> { %2892 = vtanh.f32 %v1835_v63  ;;  %v2040_v59 = vmul.f32 -1.442695, %v1835_v63 }
0x1ea2   : >> { %2894 = vpow2.f32 %v2040_v59 }
0x1eaa   : >> { %v2893_v41 = vpop.eup %2892 }
0x1eab   : >> { %1846 = vrot.lane.b32.xlu1 %v2893_v41, %s2947_s18 }
0x1eac   : >> { %v2895_v44 = vpop.eup %2894 }
0x1ead   : >> { %v1841_v49 = vadd.f32 1.0, %v2895_v44 }
0x1eaf   : >> { %2896 = vrcp.f32 %v1841_v49 }
0x1eb9   : >> { %v2897_v39 = vpop.eup %2896 }
0x1f1d   : >> { %v1847_v45 = vpop.permute.xlu1 %1846 }
0x1f1e   : >> { %v1849_v32 = vmul.f32 %v2897_v39, %v1847_v45 }
0x1f20   : >> { %2898 = vtanh.f32 %v1849_v32 }
0x1f2a   : >> { %v2899_v30 = vpop.eup %2898 }
0x1f2b   : >> { %1852 = vrot.lane.b32.xlu0 %v2899_v30, %s2948_s19 }
0x1f9d   : >> { %v1853_v40 = vpop.permute.xlu0 %1852 }
0x1f9e   : >> { %v1855_v29 = vmul.f32 %v2897_v39, %v1853_v40 }
0x1fa0   : >> { %1857 = vrot.lane.b32.xlu1 %v1855_v29, %s2948_s19 }
0x2012   : >> { %v1858_v31 = vpop.permute.xlu1 %1857 }
0x2013   : >> { %2546 = vmatmul.mubr.msk.f32.vlgmr.msra.gmra.mrb[16].mxu0 %vm443_vm1, %v1858_v31 }
0x20e6   : >> { %v1927_v33 = vpop.f32.mrb[16].mxu0 }
0x20e7   : >> { %v1928_v34 = vadd.f32 %v3171_v27, %v1927_v33  ;;  %v2547_v47 = vpop.f32.mrb[17].mxu0 }
0x20e9   : >> { %v1940_v35 = vmul.f32 2.3247106, %v1928_v34 }
0x20eb   : >> { %v1941_v36 = vadd.f32 %v1940_v35, %v1939_v51  ;;  %337 = sbr.rel (!%p335_p2) target bundleno = 50 (0x32), region = 95 }
0x20ed   : >> { %v1942_v52 = vmul.f32 %v1941_v36, %v3302_v48 }
0x20ef   : >> { %v1943_v37 = vadd.f32 %v2937_v28, %v1942_v52  }
0x20f1   : >> { %v3548_v28 = vmov %v1943_v37  ;;  %1944 = vst [vmem:[#allocation2] sm:$0xff] (%p335_p2), %v1943_v37  ;;  %1945 = vst [vmem:[%s3028_s17] sm:$0xff] (%p335_p2), %v1943_v37 }
0x20f2 PF: > { %s19_s27 = sadd.s32 1, %s2933_s27  }
0x20f3   : > { %p16_p3 = scmp.ge.s32.totalorder %s19_s27, 6  }
0x20f5   :  { %18 = sbr.rel (!%p16_p3) target bundleno = 1 (0x1), region = 106 }
0x20fc   :  { %1965 = vsyncpa [#allocation4], 1 }
0x20fd   :  { %1967 = vsyncpa [#allocation4 + $0x1], 1 }

</bundles_post_ra>
